<compile_context>
chip_gen: v5e
topology: v5e:2x2
jax: 0.10.0
libtpu: 0.0.40
codegen_flags: <defaults>
</compile_context>

<pallas_src>
import functools

import jax
import jax.numpy as jnp
import numpy as np
from jax.experimental import pallas as pl
from jax.experimental.pallas import tpu as pltpu


def _cdiv(a, b):
    return -(-a // b)


# ------------------------------ fused kernel --------------------------------

def _resnet_kernel(*refs, cfgs, bt):
    """One grid step = `bt` images, all ResBlocks + FC head, resident in VMEM."""
    n_blocks = len(cfgs)
    x_ref = refs[0]
    blk_refs = [refs[1 + 4 * i: 1 + 4 * (i + 1)] for i in range(n_blocks)]
    fcw_ref = refs[1 + 4 * n_blocks]
    fcb_ref = refs[2 + 4 * n_blocks]
    out_ref = refs[3 + 4 * n_blocks]
    acts = refs[4 + 4 * n_blocks: 4 + 5 * n_blocks]   # per-block f32 scratch

    f32, bf16 = jnp.float32, jnp.bfloat16

    def dot32(a, b):
        return jnp.dot(a, b, preferred_element_type=f32)

    def in_image_row(m, h):
        r = jax.lax.broadcasted_iota(jnp.int32, (m, 1), 0)
        if h & (h - 1) == 0:                 # h is a power of two here
            return jnp.bitwise_and(r, h - 1)
        return jax.lax.rem(r, h)

    def shifted(x, d, h):
        """y[r] = x[r-d] (d in {+1,-1}); zero at per-image top/bottom edges."""
        m, wc = x.shape
        zero = jnp.zeros((1, wc), x.dtype)
        if d == 1:                           # tap for input row (ho - 1)
            y = jnp.concatenate([zero, x[:m - 1, :]], axis=0)
            edge = 0
        else:                                # tap for input row (ho + 1)
            y = jnp.concatenate([x[1:, :], zero], axis=0)
            edge = h - 1
        if m > h:                            # stacked batch: interior image edges
            keep = (in_image_row(m, h) != edge).astype(x.dtype)   # exact 0/1
            y = y * keep
        return y

    def taps_cat(x, h):
        """(M, WC) f32 -> (M, 3*WC) bf16: [row ho-1 | row ho | row ho+1]."""
        return jnp.concatenate([shifted(x, 1, h), x, shifted(x, -1, h)],
                               axis=-1).astype(bf16)

    a = x_ref[0].astype(f32)                 # (bt*H0, 128); bf16 values in f32

    for i, (w1_ref, wsc_ref, w2_ref, bn_ref) in enumerate(blk_refs):
        cfg = cfgs[i]
        hin, hout, stride, sc_taps = (cfg["hin"], cfg["hout"], cfg["stride"],
                                      cfg["sc_taps"])
        bn = bn_ref[...]                     # (6, Wout*Cout) folded-BN rows

        if stride == 1:
            xcat = taps_cat(a, hin)                          # (M, 3*WC) bf16
            sc_in = a.astype(bf16) if sc_taps == 1 else xcat
        else:
            # Stride-2 row subsampling straight off the previous block's VMEM
            # scratch (no MXU selection matmuls).  hin == 2*hout, so the
            # stacked strided read never crosses an image boundary.
            mo = bt * hout
            x_mid = acts[i - 1][pl.ds(0, mo, stride=2), :]   # rows 2*ho
            x_bot = acts[i - 1][pl.ds(1, mo, stride=2), :]   # rows 2*ho + 1
            x_top = shifted(x_bot, 1, hout)                  # rows 2*ho - 1
            xcat = jnp.concatenate([x_top, x_mid, x_bot], axis=-1).astype(bf16)
            sc_in = xcat                     # 3x3/stride-2 shortcut reuses taps

        # conv1 (3x3, stride s) + folded BN + ReLU  -- one K=3*WC MXU dot.
        h = jnp.maximum(dot32(xcat, w1_ref[...]) * bn[0:1, :] + bn[1:2, :], 0.0)
        # TODO(synk): train-time dropout between ReLU and conv2 is an inference no-op.

        # projection shortcut (1x1 or 3x3/stride-2) + folded BN.
        sc = dot32(sc_in, wsc_ref[...]) * bn[2:3, :] + bn[3:4, :]

        # conv2 (3x3, stride 1) + folded BN + residual add + ReLU.
        y = jnp.maximum(dot32(taps_cat(h, hout), w2_ref[...]) * bn[4:5, :]
                        + bn[5:6, :] + sc, 0.0)

        if i < n_blocks - 1:
            y = y.astype(bf16).astype(f32)   # inter-block bf16 rounding
        acts[i][...] = y
        a = y

    # Fused FC head: gather each image's rows of the last activation with a
    # stride-Hout read, concatenate along lanes (NHWC flatten) -> one K dot,
    # lane-dense (cls padded to 128) output.
    h_last = cfgs[-1]["hout"]
    parts = [acts[-1][pl.ds(r, bt, stride=h_last), :] for r in range(h_last)]
    fc_in = jnp.concatenate(parts, axis=-1)                  # (bt, h_last*128)
    out_ref[0] = dot32(fc_in, fcw_ref[...]) + fcb_ref[...]


def _resnet_call(a, params, cfgs, bt, nsteps):
    """a: (nsteps, bt*H0, W0*C0pad) bf16 -> (nsteps, bt, cls_pad) f32."""
    _, rows0, lanes0 = a.shape
    cls_pad = params["fcw"].shape[1]
    kern = functools.partial(_resnet_kernel, cfgs=cfgs, bt=bt)

    full = lambda b: (0, 0)                  # weights: resident every step
    in_specs = [pl.BlockSpec((1, rows0, lanes0), lambda b: (b, 0, 0))]
    args = [a]
    for p in params["blocks"]:
        for name in ("w1", "wsc", "w2", "bn"):
            in_specs.append(pl.BlockSpec(p[name].shape, full))
            args.append(p[name])
    in_specs += [pl.BlockSpec(params["fcw"].shape, full),
                 pl.BlockSpec(params["fcb"].shape, full)]
    args += [params["fcw"], params["fcb"]]

    out_shape = jax.ShapeDtypeStruct((nsteps, bt, cls_pad), jnp.float32)
    out_spec = pl.BlockSpec((1, bt, cls_pad), lambda b: (b, 0, 0))
    scratch = [pltpu.VMEM((bt * c["hout"], c["nout"]), jnp.float32)
               for c in cfgs]

    return pl.pallas_call(
        kern,
        out_shape=out_shape,
        grid=(nsteps,),
        in_specs=in_specs,
        out_specs=out_spec,
        scratch_shapes=scratch,
        compiler_params=pltpu.CompilerParams(
            dimension_semantics=("parallel",)),
    )(*args)


# --------------------------- init-time weight prep ---------------------------

def _expand_conv_w_cat(w, w_in, w_out, stride, pad):
    """(kh,kw,cin,cout) -> (kh*w_in*cin, w_out*cout) block-Toeplitz weights,
    row taps stacked along K in [ho-1 | ho | ho+1] order."""
    kh, kw, cin, cout = w.shape
    taps = np.zeros((kh, w_in * cin, w_out * cout), np.float32)
    for di in range(kh):
        for wo in range(w_out):
            for dj in range(kw):
                wi = stride * wo + dj - pad
                if 0 <= wi < w_in:
                    taps[di, wi * cin:(wi + 1) * cin,
                         wo * cout:(wo + 1) * cout] = w[di, dj]
    return taps.reshape(kh * w_in * cin, w_out * cout)


def _init_resblock(key, cin, cout, h_in, w_in, *, stride, conv_size, padding,
                   shortcut_size, use_bias, cin_pad):
    h_out = (h_in + 2 * padding - conv_size) // stride + 1
    w_out = (w_in + 2 * padding - conv_size) // stride + 1
    if stride == 2:
        # The batch-stacked strided-read layout requires h_in == 2*h_out.
        assert h_in == 2 * h_out, "stride-2 block needs an even input height"
    k = jax.random.split(key, 12)

    def conv_w(kk, kh, kw, ci, co):
        std = 1.0 / np.sqrt(kh * kw * ci)
        return np.asarray(jax.random.normal(kk, (kh, kw, ci, co), jnp.float32)) * std

    def conv_b(kk, co):
        if use_bias:
            return np.asarray(jax.random.normal(kk, (co,), jnp.float32)) * 0.01
        return np.zeros((co,), np.float32)

    def fold_bn(kg, kb, co, cb, eps=1e-5):
        gamma = 1.0 + 0.1 * np.asarray(jax.random.normal(kg, (co,), jnp.float32))
        beta = 0.1 * np.asarray(jax.random.normal(kb, (co,), jnp.float32))
        mean = np.zeros((co,), np.float32)
        var = np.ones((co,), np.float32)
        scale = gamma / np.sqrt(var + eps)
        bias = beta + scale * (cb - mean)
        return scale, bias

    w1 = conv_w(k[0], conv_size, conv_size, cin, cout)
    s1, b1 = fold_bn(k[2], k[3], cout, conv_b(k[1], cout))
    w2 = conv_w(k[4], conv_size, conv_size, cout, cout)
    s2, b2 = fold_bn(k[6], k[7], cout, conv_b(k[5], cout))
    ws = conv_w(k[8], shortcut_size, shortcut_size, cin, cout)
    ss, bs = fold_bn(k[10], k[11], cout, conv_b(k[9], cout))

    # MXU operands are bf16; round the conv weights once so the pure-JAX
    # reference uses the exact same values.
    rnd = lambda a_: np.asarray(jnp.asarray(a_, jnp.bfloat16).astype(jnp.float32))
    w1, w2, ws = rnd(w1), rnd(w2), rnd(ws)

    def pad_cin(w):
        if cin_pad == cin:
            return w
        out = np.zeros(w.shape[:2] + (cin_pad, w.shape[3]), np.float32)
        out[:, :, :cin, :] = w
        return out

    sc_pad = shortcut_size // 2
    params = dict(
        w1=jnp.asarray(_expand_conv_w_cat(pad_cin(w1), w_in, w_out, stride,
                                          padding), jnp.bfloat16),
        wsc=jnp.asarray(_expand_conv_w_cat(pad_cin(ws), w_in, w_out, stride,
                                           sc_pad), jnp.bfloat16),
        w2=jnp.asarray(_expand_conv_w_cat(w2, w_out, w_out, 1, padding),
                       jnp.bfloat16),
        bn=jnp.asarray(np.stack([np.tile(s1, w_out), np.tile(b1, w_out),
                                 np.tile(ss, w_out), np.tile(bs, w_out),
                                 np.tile(s2, w_out), np.tile(b2, w_out)]),
                       jnp.float32),
    )
    cfg = dict(stride=stride, sc_taps=(1 if shortcut_size == 1 else 3),
               sc_k=shortcut_size, hin=h_in, hout=h_out, nout=w_out * cout)
    raw = dict(w1=jnp.asarray(w1), s1=jnp.asarray(s1), b1=jnp.asarray(b1),
               w2=jnp.asarray(w2), s2=jnp.asarray(s2), b2=jnp.asarray(b2),
               ws=jnp.asarray(ws), ss=jnp.asarray(ss), bs=jnp.asarray(bs))
    return cfg, params, raw, h_out, w_out


def init_model(key, in_channel=4, cls_num=8, res_num=2, in_size=16):
    keys = jax.random.split(key, res_num + 2)
    # Zero-pad block-0 input channels so the first activation is >=128 lanes
    # wide (lane-dense loads, full-K MXU feeds).  Padding only, never shrinks.
    cin_eff = max(in_channel, _cdiv(128, in_size))

    cfgs, blocks, raws = [], [], []
    channel, h, w = in_channel, in_size, in_size

    cfg, p, r, h, w = _init_resblock(keys[0], channel, channel * 2, h, w,
                                     stride=1, conv_size=3, padding=1,
                                     shortcut_size=1, use_bias=True,
                                     cin_pad=cin_eff)
    cfgs.append(cfg); blocks.append(p); raws.append(r); channel *= 2

    for i in range(res_num):
        cfg, p, r, h, w = _init_resblock(keys[i + 1], channel, channel * 2, h, w,
                                         stride=2, conv_size=3, padding=1,
                                         shortcut_size=3, use_bias=False,
                                         cin_pad=channel)
        cfgs.append(cfg); blocks.append(p); raws.append(r); channel *= 2

    # FC head (fused into the kernel).  Rows follow the NHWC flatten the
    # kernel produces; cls is padded to a multiple of 128 for lane-dense
    # stores and sliced back in the wrapper.  To load PyTorch NCHW-flatten
    # weights, permute the rows once here.
    fc_in = h * w * channel
    cls_pad = _cdiv(cls_num, 128) * 128
    kfw, kfb = jax.random.split(keys[-1])
    fc_w = np.asarray(jax.random.normal(kfw, (fc_in, cls_num), jnp.float32)) / np.sqrt(fc_in)
    fc_b = np.asarray(jax.random.normal(kfb, (1, cls_num), jnp.float32)) * 0.01
    fcw_pad = np.zeros((fc_in, cls_pad), np.float32); fcw_pad[:, :cls_num] = fc_w
    fcb_pad = np.zeros((1, cls_pad), np.float32); fcb_pad[:, :cls_num] = fc_b

    params = dict(blocks=blocks, fcw=jnp.asarray(fcw_pad), fcb=jnp.asarray(fcb_pad))
    raw = dict(blocks=raws, fc_w=jnp.asarray(fc_w), fc_b=jnp.asarray(fc_b))
    model = dict(cfgs=cfgs, cin_eff=cin_eff, cls_num=cls_num, cls_pad=cls_pad)
    return model, params, raw


# ------------------------------- forward -------------------------------------

def _choose_tiling(batch, h0):
    """Pick images-per-step so M ~ 128-256 rows, keep >=2 grid steps (v7x)."""
    bt_cap = max(1, 256 // h0)
    if batch >= 2:
        nsteps = max(2, _cdiv(batch, bt_cap))
        bt = _cdiv(batch, nsteps)
        nsteps = max(2, _cdiv(batch, bt))
    else:
        nsteps, bt = 1, 1
    return bt, nsteps, bt * nsteps


def make_forward(model):
    cfgs = model["cfgs"]
    cin_eff = model["cin_eff"]
    cls_num = model["cls_num"]

    def forward(params, x_nchw):
        # Reference does x.squeeze(); for supported 4-D NCHW inputs (no size-1
        # dims) that is a no-op, which we mirror explicitly.
        if 1 in x_nchw.shape:
            raise ValueError("expected 4-D NCHW input without size-1 dims "
                             "(PyTorch x.squeeze() would change the rank)")
        B, C, H, W = x_nchw.shape
        bt, nsteps, b_pad = _choose_tiling(B, H)
        a = jnp.transpose(x_nchw, (0, 2, 3, 1))            # NHWC
        if cin_eff > C:
            a = jnp.pad(a, ((0, 0), (0, 0), (0, 0), (0, cin_eff - C)))
        if b_pad > B:
            a = jnp.pad(a, ((0, b_pad - B), (0, 0), (0, 0), (0, 0)))
        a = a.reshape(nsteps, bt * H, W * cin_eff).astype(jnp.bfloat16)
        out = _resnet_call(a, params, cfgs, bt, nsteps)     # (nsteps, bt, cls_pad)
        return out.reshape(b_pad, model["cls_pad"])[:B, :cls_num]

    return forward


# ----------------------- pure-JAX reference (for checking) -------------------

def _round_bf16(x):
    return x.astype(jnp.bfloat16).astype(jnp.float32)


def _ref_conv(x, w, stride, pad):
    return jax.lax.conv_general_dilated(
        x, w, window_strides=(stride, stride),
        padding=[(pad, pad), (pad, pad)],
        dimension_numbers=("NHWC", "HWIO", "NHWC"),
        precision=jax.lax.Precision.HIGHEST)


def reference_forward(x_nchw, raw, cfgs):
    """XLA-conv reference with the same bf16 rounding points as the kernel."""
    a = _round_bf16(jnp.transpose(x_nchw, (0, 2, 3, 1)))
    n = len(cfgs)
    for i, (r, cfg) in enumerate(zip(raw["blocks"], cfgs)):
        s = cfg["stride"]
        h = jnp.maximum(_ref_conv(a, r["w1"], s, 1) * r["s1"] + r["b1"], 0.0)
        sc = _ref_conv(a, r["ws"], s, cfg["sc_k"] // 2) * r["ss"] + r["bs"]
        y = _ref_conv(_round_bf16(h), r["w2"], 1, 1) * r["s2"] + r["b2"] + sc
        out = jnp.maximum(y, 0.0)
        a = out if i == n - 1 else _round_bf16(out)
    flat = a.reshape(a.shape[0], -1)            # NHWC flatten (matches kernel)
    return flat @ raw["fc_w"] + raw["fc_b"]


# --------------------------------- main ---------------------------------------

if __name__ == "__main__":
    key = jax.random.PRNGKey(0)
    kx, kp = jax.random.split(key)
    # small config: batch=4, in_channel=4, in_size=16, res_num=2, cls_num=8
    x = jax.random.normal(kx, (4, 4, 16, 16), jnp.float32)

    model, params, raw = init_model(kp, in_channel=4, cls_num=8, res_num=2,
                                    in_size=16)
    fwd = jax.jit(make_forward(model))

    out = fwd(params, x)
    jax.block_until_ready(out)
    assert out.shape == (4, 8), out.shape
    assert bool(jnp.all(jnp.isfinite(out)))

    ref = reference_forward(x, raw, model["cfgs"])
    np.testing.assert_allclose(np.asarray(out), np.asarray(ref),
                               rtol=2e-2, atol=2e-2)

    print("KERNEL_OK")
</pallas_src>

<mosaic_0001>
module attributes {stable_mosaic.version = 11 : i64} {
  func.func @_resnet_kernel(%arg0: i32, %arg1: memref<1x32x128xbf16, #tpu.memory_space<vmem>>, %arg2: memref<384x128xbf16, #tpu.memory_space<vmem>>, %arg3: memref<128x128xbf16, #tpu.memory_space<vmem>>, %arg4: memref<384x128xbf16, #tpu.memory_space<vmem>>, %arg5: memref<6x128xf32, #tpu.memory_space<vmem>>, %arg6: memref<384x128xbf16, #tpu.memory_space<vmem>>, %arg7: memref<384x128xbf16, #tpu.memory_space<vmem>>, %arg8: memref<384x128xbf16, #tpu.memory_space<vmem>>, %arg9: memref<6x128xf32, #tpu.memory_space<vmem>>, %arg10: memref<384x128xbf16, #tpu.memory_space<vmem>>, %arg11: memref<384x128xbf16, #tpu.memory_space<vmem>>, %arg12: memref<384x128xbf16, #tpu.memory_space<vmem>>, %arg13: memref<6x128xf32, #tpu.memory_space<vmem>>, %arg14: memref<512x128xf32, #tpu.memory_space<vmem>>, %arg15: memref<1x128xf32, #tpu.memory_space<vmem>>, %arg16: memref<1x2x128xf32, #tpu.memory_space<vmem>>, %arg17: memref<32x128xf32, #tpu.memory_space<vmem>>, %arg18: memref<16x128xf32, #tpu.memory_space<vmem>>, %arg19: memref<8x128xf32, #tpu.memory_space<vmem>>) attributes {dimension_semantics = [#tpu.dimension_semantics<parallel>], iteration_bounds = array<i64: 2>, scalar_prefetch = 0 : i64, scratch_operands = 3 : i64, tpu.core_type = #tpu.core_type<tc>, window_params = [{transform_indices = @transform_0, window_bounds = array<i64: 1, 32, 128>}, {pipeline_mode = #tpu.pipeline_mode<synchronous>, transform_indices = @transform_1, window_bounds = array<i64: 384, 128>}, {pipeline_mode = #tpu.pipeline_mode<synchronous>, transform_indices = @transform_2, window_bounds = array<i64: 128, 128>}, {pipeline_mode = #tpu.pipeline_mode<synchronous>, transform_indices = @transform_3, window_bounds = array<i64: 384, 128>}, {pipeline_mode = #tpu.pipeline_mode<synchronous>, transform_indices = @transform_4, window_bounds = array<i64: 6, 128>}, {pipeline_mode = #tpu.pipeline_mode<synchronous>, transform_indices = @transform_5, window_bounds = array<i64: 384, 128>}, {pipeline_mode = #tpu.pipeline_mode<synchronous>, transform_indices = @transform_6, window_bounds = array<i64: 384, 128>}, {pipeline_mode = #tpu.pipeline_mode<synchronous>, transform_indices = @transform_7, window_bounds = array<i64: 384, 128>}, {pipeline_mode = #tpu.pipeline_mode<synchronous>, transform_indices = @transform_8, window_bounds = array<i64: 6, 128>}, {pipeline_mode = #tpu.pipeline_mode<synchronous>, transform_indices = @transform_9, window_bounds = array<i64: 384, 128>}, {pipeline_mode = #tpu.pipeline_mode<synchronous>, transform_indices = @transform_10, window_bounds = array<i64: 384, 128>}, {pipeline_mode = #tpu.pipeline_mode<synchronous>, transform_indices = @transform_11, window_bounds = array<i64: 384, 128>}, {pipeline_mode = #tpu.pipeline_mode<synchronous>, transform_indices = @transform_12, window_bounds = array<i64: 6, 128>}, {pipeline_mode = #tpu.pipeline_mode<synchronous>, transform_indices = @transform_13, window_bounds = array<i64: 512, 128>}, {pipeline_mode = #tpu.pipeline_mode<synchronous>, transform_indices = @transform_14, window_bounds = array<i64: 1, 128>}, {transform_indices = @transform_15, window_bounds = array<i64: 1, 2, 128>}]} {
    %c0 = arith.constant 0 : index
    %c0_0 = arith.constant 0 : index
    %c0_1 = arith.constant 0 : index
    %0 = vector.load %arg1[%c0, %c0_0, %c0_1] : memref<1x32x128xbf16, #tpu.memory_space<vmem>>, vector<1x32x128xbf16>
    %1 = vector.shape_cast %0 : vector<1x32x128xbf16> to vector<32x128xbf16>
    %2 = arith.extf %1 : vector<32x128xbf16> to vector<32x128xf32>
    %c0_2 = arith.constant 0 : index
    %c0_3 = arith.constant 0 : index
    %3 = vector.load %arg5[%c0_2, %c0_3] : memref<6x128xf32, #tpu.memory_space<vmem>>, vector<6x128xf32>
    %cst = arith.constant 0.000000e+00 : f32
    %4 = vector.broadcast %cst : f32 to vector<1x128xf32>
    %5 = vector.extract_strided_slice %2 {offsets = [0, 0], sizes = [31, 128], strides = [1, 1]} : vector<32x128xf32> to vector<31x128xf32>
    %6 = tpu.concatenate %4, %5 in 0 : vector<1x128xf32>, vector<31x128xf32> -> vector<32x128xf32>
    %7 = tpu.iota {dimensions = array<i32: 0>} : vector<32x1xi32>
    %c15_i32 = arith.constant 15 : i32
    %8 = vector.broadcast %c15_i32 : i32 to vector<32x1xi32>
    %9 = arith.andi %7, %8 : vector<32x1xi32>
    %c0_i32 = arith.constant 0 : i32
    %10 = vector.broadcast %c0_i32 : i32 to vector<32x1xi32>
    %11 = arith.cmpi ne, %9, %10 : vector<32x1xi32>
    %12 = arith.extui %11 : vector<32x1xi1> to vector<32x1xi32>
    %13 = arith.sitofp %12 : vector<32x1xi32> to vector<32x1xf32>
    %14 = vector.broadcast %13 : vector<32x1xf32> to vector<32x128xf32>
    %15 = arith.mulf %6, %14 : vector<32x128xf32>
    %cst_4 = arith.constant 0.000000e+00 : f32
    %16 = vector.broadcast %cst_4 : f32 to vector<1x128xf32>
    %17 = vector.extract_strided_slice %2 {offsets = [1, 0], sizes = [31, 128], strides = [1, 1]} : vector<32x128xf32> to vector<31x128xf32>
    %18 = tpu.concatenate %17, %16 in 0 : vector<31x128xf32>, vector<1x128xf32> -> vector<32x128xf32>
    %19 = tpu.iota {dimensions = array<i32: 0>} : vector<32x1xi32>
    %c15_i32_5 = arith.constant 15 : i32
    %20 = vector.broadcast %c15_i32_5 : i32 to vector<32x1xi32>
    %21 = arith.andi %19, %20 : vector<32x1xi32>
    %c15_i32_6 = arith.constant 15 : i32
    %22 = vector.broadcast %c15_i32_6 : i32 to vector<32x1xi32>
    %23 = arith.cmpi ne, %21, %22 : vector<32x1xi32>
    %24 = arith.extui %23 : vector<32x1xi1> to vector<32x1xi32>
    %25 = arith.sitofp %24 : vector<32x1xi32> to vector<32x1xf32>
    %26 = vector.broadcast %25 : vector<32x1xf32> to vector<32x128xf32>
    %27 = arith.mulf %18, %26 : vector<32x128xf32>
    %28 = tpu.concatenate %15, %2, %27 in 1 : vector<32x128xf32>, vector<32x128xf32>, vector<32x128xf32> -> vector<32x384xf32>
    %29 = arith.truncf %28 : vector<32x384xf32> to vector<32x384xbf16>
    %30 = arith.truncf %2 : vector<32x128xf32> to vector<32x128xbf16>
    %c0_7 = arith.constant 0 : index
    %c0_8 = arith.constant 0 : index
    %31 = vector.load %arg2[%c0_7, %c0_8] : memref<384x128xbf16, #tpu.memory_space<vmem>>, vector<384x128xbf16>
    %cst_9 = arith.constant dense<0.000000e+00> : vector<32x128xf32>
    %32 = tpu.matmul %29, %31, %cst_9 {dimension_numbers = #tpu.dot_dimension_numbers<[1], [0], [0], [1], [0, 0, 1, 1], [], []>} : vector<32x384xbf16>, vector<384x128xbf16>, vector<32x128xf32> -> vector<32x128xf32>
    %33 = vector.extract_strided_slice %3 {offsets = [0, 0], sizes = [1, 128], strides = [1, 1]} : vector<6x128xf32> to vector<1x128xf32>
    %34 = vector.broadcast %33 : vector<1x128xf32> to vector<32x128xf32>
    %35 = arith.mulf %32, %34 : vector<32x128xf32>
    %36 = vector.extract_strided_slice %3 {offsets = [1, 0], sizes = [1, 128], strides = [1, 1]} : vector<6x128xf32> to vector<1x128xf32>
    %37 = vector.broadcast %36 : vector<1x128xf32> to vector<32x128xf32>
    %38 = arith.addf %35, %37 : vector<32x128xf32>
    %cst_10 = arith.constant 0.000000e+00 : f32
    %39 = vector.broadcast %cst_10 : f32 to vector<32x128xf32>
    %40 = arith.maximumf %38, %39 : vector<32x128xf32>
    %c0_11 = arith.constant 0 : index
    %c0_12 = arith.constant 0 : index
    %41 = vector.load %arg3[%c0_11, %c0_12] : memref<128x128xbf16, #tpu.memory_space<vmem>>, vector<128x128xbf16>
    %cst_13 = arith.constant dense<0.000000e+00> : vector<32x128xf32>
    %42 = tpu.matmul %30, %41, %cst_13 {dimension_numbers = #tpu.dot_dimension_numbers<[1], [0], [0], [1], [0, 0, 1, 1], [], []>} : vector<32x128xbf16>, vector<128x128xbf16>, vector<32x128xf32> -> vector<32x128xf32>
    %43 = vector.extract_strided_slice %3 {offsets = [2, 0], sizes = [1, 128], strides = [1, 1]} : vector<6x128xf32> to vector<1x128xf32>
    %44 = vector.broadcast %43 : vector<1x128xf32> to vector<32x128xf32>
    %45 = arith.mulf %42, %44 : vector<32x128xf32>
    %46 = vector.extract_strided_slice %3 {offsets = [3, 0], sizes = [1, 128], strides = [1, 1]} : vector<6x128xf32> to vector<1x128xf32>
    %47 = vector.broadcast %46 : vector<1x128xf32> to vector<32x128xf32>
    %48 = arith.addf %45, %47 : vector<32x128xf32>
    %cst_14 = arith.constant 0.000000e+00 : f32
    %49 = vector.broadcast %cst_14 : f32 to vector<1x128xf32>
    %50 = vector.extract_strided_slice %40 {offsets = [0, 0], sizes = [31, 128], strides = [1, 1]} : vector<32x128xf32> to vector<31x128xf32>
    %51 = tpu.concatenate %49, %50 in 0 : vector<1x128xf32>, vector<31x128xf32> -> vector<32x128xf32>
    %52 = tpu.iota {dimensions = array<i32: 0>} : vector<32x1xi32>
    %c15_i32_15 = arith.constant 15 : i32
    %53 = vector.broadcast %c15_i32_15 : i32 to vector<32x1xi32>
    %54 = arith.andi %52, %53 : vector<32x1xi32>
    %c0_i32_16 = arith.constant 0 : i32
    %55 = vector.broadcast %c0_i32_16 : i32 to vector<32x1xi32>
    %56 = arith.cmpi ne, %54, %55 : vector<32x1xi32>
    %57 = arith.extui %56 : vector<32x1xi1> to vector<32x1xi32>
    %58 = arith.sitofp %57 : vector<32x1xi32> to vector<32x1xf32>
    %59 = vector.broadcast %58 : vector<32x1xf32> to vector<32x128xf32>
    %60 = arith.mulf %51, %59 : vector<32x128xf32>
    %cst_17 = arith.constant 0.000000e+00 : f32
    %61 = vector.broadcast %cst_17 : f32 to vector<1x128xf32>
    %62 = vector.extract_strided_slice %40 {offsets = [1, 0], sizes = [31, 128], strides = [1, 1]} : vector<32x128xf32> to vector<31x128xf32>
    %63 = tpu.concatenate %62, %61 in 0 : vector<31x128xf32>, vector<1x128xf32> -> vector<32x128xf32>
    %64 = tpu.iota {dimensions = array<i32: 0>} : vector<32x1xi32>
    %c15_i32_18 = arith.constant 15 : i32
    %65 = vector.broadcast %c15_i32_18 : i32 to vector<32x1xi32>
    %66 = arith.andi %64, %65 : vector<32x1xi32>
    %c15_i32_19 = arith.constant 15 : i32
    %67 = vector.broadcast %c15_i32_19 : i32 to vector<32x1xi32>
    %68 = arith.cmpi ne, %66, %67 : vector<32x1xi32>
    %69 = arith.extui %68 : vector<32x1xi1> to vector<32x1xi32>
    %70 = arith.sitofp %69 : vector<32x1xi32> to vector<32x1xf32>
    %71 = vector.broadcast %70 : vector<32x1xf32> to vector<32x128xf32>
    %72 = arith.mulf %63, %71 : vector<32x128xf32>
    %73 = tpu.concatenate %60, %40, %72 in 1 : vector<32x128xf32>, vector<32x128xf32>, vector<32x128xf32> -> vector<32x384xf32>
    %74 = arith.truncf %73 : vector<32x384xf32> to vector<32x384xbf16>
    %c0_20 = arith.constant 0 : index
    %c0_21 = arith.constant 0 : index
    %75 = vector.load %arg4[%c0_20, %c0_21] : memref<384x128xbf16, #tpu.memory_space<vmem>>, vector<384x128xbf16>
    %cst_22 = arith.constant dense<0.000000e+00> : vector<32x128xf32>
    %76 = tpu.matmul %74, %75, %cst_22 {dimension_numbers = #tpu.dot_dimension_numbers<[1], [0], [0], [1], [0, 0, 1, 1], [], []>} : vector<32x384xbf16>, vector<384x128xbf16>, vector<32x128xf32> -> vector<32x128xf32>
    %77 = vector.extract_strided_slice %3 {offsets = [4, 0], sizes = [1, 128], strides = [1, 1]} : vector<6x128xf32> to vector<1x128xf32>
    %78 = vector.broadcast %77 : vector<1x128xf32> to vector<32x128xf32>
    %79 = arith.mulf %76, %78 : vector<32x128xf32>
    %80 = vector.extract_strided_slice %3 {offsets = [5, 0], sizes = [1, 128], strides = [1, 1]} : vector<6x128xf32> to vector<1x128xf32>
    %81 = vector.broadcast %80 : vector<1x128xf32> to vector<32x128xf32>
    %82 = arith.addf %79, %81 : vector<32x128xf32>
    %83 = arith.addf %82, %48 : vector<32x128xf32>
    %cst_23 = arith.constant 0.000000e+00 : f32
    %84 = vector.broadcast %cst_23 : f32 to vector<32x128xf32>
    %85 = arith.maximumf %83, %84 : vector<32x128xf32>
    %86 = arith.truncf %85 : vector<32x128xf32> to vector<32x128xbf16>
    %87 = arith.extf %86 : vector<32x128xbf16> to vector<32x128xf32>
    %c0_24 = arith.constant 0 : index
    %c0_25 = arith.constant 0 : index
    %88 = vector.load %arg17[%c0_24, %c0_25] : memref<32x128xf32, #tpu.memory_space<vmem>>, vector<32x128xf32>
    tpu.vector_store %arg17[%c0_24, %c0_25], %87 {strides = array<i32>} : memref<32x128xf32, #tpu.memory_space<vmem>>, vector<32x128xf32>,
    %c0_26 = arith.constant 0 : index
    %c0_27 = arith.constant 0 : index
    %89 = vector.load %arg9[%c0_26, %c0_27] : memref<6x128xf32, #tpu.memory_space<vmem>>, vector<6x128xf32>
    %c0_28 = arith.constant 0 : index
    %c0_29 = arith.constant 0 : index
    %90 = tpu.strided_load %arg17[%c0_28, %c0_29] {strides = array<i32: 2, 1>} : memref<32x128xf32, #tpu.memory_space<vmem>>, vector<16x128xf32>
    %c1 = arith.constant 1 : index
    %c0_30 = arith.constant 0 : index
    %91 = tpu.strided_load %arg17[%c1, %c0_30] {strides = array<i32: 2, 1>} : memref<32x128xf32, #tpu.memory_space<vmem>>, vector<16x128xf32>
    %cst_31 = arith.constant 0.000000e+00 : f32
    %92 = vector.broadcast %cst_31 : f32 to vector<1x128xf32>
    %93 = vector.extract_strided_slice %91 {offsets = [0, 0], sizes = [15, 128], strides = [1, 1]} : vector<16x128xf32> to vector<15x128xf32>
    %94 = tpu.concatenate %92, %93 in 0 : vector<1x128xf32>, vector<15x128xf32> -> vector<16x128xf32>
    %95 = tpu.iota {dimensions = array<i32: 0>} : vector<16x1xi32>
    %c7_i32 = arith.constant 7 : i32
    %96 = vector.broadcast %c7_i32 : i32 to vector<16x1xi32>
    %97 = arith.andi %95, %96 : vector<16x1xi32>
    %c0_i32_32 = arith.constant 0 : i32
    %98 = vector.broadcast %c0_i32_32 : i32 to vector<16x1xi32>
    %99 = arith.cmpi ne, %97, %98 : vector<16x1xi32>
    %100 = arith.extui %99 : vector<16x1xi1> to vector<16x1xi32>
    %101 = arith.sitofp %100 : vector<16x1xi32> to vector<16x1xf32>
    %102 = vector.broadcast %101 : vector<16x1xf32> to vector<16x128xf32>
    %103 = arith.mulf %94, %102 : vector<16x128xf32>
    %104 = tpu.concatenate %103, %90, %91 in 1 : vector<16x128xf32>, vector<16x128xf32>, vector<16x128xf32> -> vector<16x384xf32>
    %105 = arith.truncf %104 : vector<16x384xf32> to vector<16x384xbf16>
    %c0_33 = arith.constant 0 : index
    %c0_34 = arith.constant 0 : index
    %106 = vector.load %arg6[%c0_33, %c0_34] : memref<384x128xbf16, #tpu.memory_space<vmem>>, vector<384x128xbf16>
    %cst_35 = arith.constant dense<0.000000e+00> : vector<16x128xf32>
    %107 = tpu.matmul %105, %106, %cst_35 {dimension_numbers = #tpu.dot_dimension_numbers<[1], [0], [0], [1], [0, 0, 1, 1], [], []>} : vector<16x384xbf16>, vector<384x128xbf16>, vector<16x128xf32> -> vector<16x128xf32>
    %108 = vector.extract_strided_slice %89 {offsets = [0, 0], sizes = [1, 128], strides = [1, 1]} : vector<6x128xf32> to vector<1x128xf32>
    %109 = vector.broadcast %108 : vector<1x128xf32> to vector<16x128xf32>
    %110 = arith.mulf %107, %109 : vector<16x128xf32>
    %111 = vector.extract_strided_slice %89 {offsets = [1, 0], sizes = [1, 128], strides = [1, 1]} : vector<6x128xf32> to vector<1x128xf32>
    %112 = vector.broadcast %111 : vector<1x128xf32> to vector<16x128xf32>
    %113 = arith.addf %110, %112 : vector<16x128xf32>
    %cst_36 = arith.constant 0.000000e+00 : f32
    %114 = vector.broadcast %cst_36 : f32 to vector<16x128xf32>
    %115 = arith.maximumf %113, %114 : vector<16x128xf32>
    %c0_37 = arith.constant 0 : index
    %c0_38 = arith.constant 0 : index
    %116 = vector.load %arg7[%c0_37, %c0_38] : memref<384x128xbf16, #tpu.memory_space<vmem>>, vector<384x128xbf16>
    %cst_39 = arith.constant dense<0.000000e+00> : vector<16x128xf32>
    %117 = tpu.matmul %105, %116, %cst_39 {dimension_numbers = #tpu.dot_dimension_numbers<[1], [0], [0], [1], [0, 0, 1, 1], [], []>} : vector<16x384xbf16>, vector<384x128xbf16>, vector<16x128xf32> -> vector<16x128xf32>
    %118 = vector.extract_strided_slice %89 {offsets = [2, 0], sizes = [1, 128], strides = [1, 1]} : vector<6x128xf32> to vector<1x128xf32>
    %119 = vector.broadcast %118 : vector<1x128xf32> to vector<16x128xf32>
    %120 = arith.mulf %117, %119 : vector<16x128xf32>
    %121 = vector.extract_strided_slice %89 {offsets = [3, 0], sizes = [1, 128], strides = [1, 1]} : vector<6x128xf32> to vector<1x128xf32>
    %122 = vector.broadcast %121 : vector<1x128xf32> to vector<16x128xf32>
    %123 = arith.addf %120, %122 : vector<16x128xf32>
    %cst_40 = arith.constant 0.000000e+00 : f32
    %124 = vector.broadcast %cst_40 : f32 to vector<1x128xf32>
    %125 = vector.extract_strided_slice %115 {offsets = [0, 0], sizes = [15, 128], strides = [1, 1]} : vector<16x128xf32> to vector<15x128xf32>
    %126 = tpu.concatenate %124, %125 in 0 : vector<1x128xf32>, vector<15x128xf32> -> vector<16x128xf32>
    %127 = tpu.iota {dimensions = array<i32: 0>} : vector<16x1xi32>
    %c7_i32_41 = arith.constant 7 : i32
    %128 = vector.broadcast %c7_i32_41 : i32 to vector<16x1xi32>
    %129 = arith.andi %127, %128 : vector<16x1xi32>
    %c0_i32_42 = arith.constant 0 : i32
    %130 = vector.broadcast %c0_i32_42 : i32 to vector<16x1xi32>
    %131 = arith.cmpi ne, %129, %130 : vector<16x1xi32>
    %132 = arith.extui %131 : vector<16x1xi1> to vector<16x1xi32>
    %133 = arith.sitofp %132 : vector<16x1xi32> to vector<16x1xf32>
    %134 = vector.broadcast %133 : vector<16x1xf32> to vector<16x128xf32>
    %135 = arith.mulf %126, %134 : vector<16x128xf32>
    %cst_43 = arith.constant 0.000000e+00 : f32
    %136 = vector.broadcast %cst_43 : f32 to vector<1x128xf32>
    %137 = vector.extract_strided_slice %115 {offsets = [1, 0], sizes = [15, 128], strides = [1, 1]} : vector<16x128xf32> to vector<15x128xf32>
    %138 = tpu.concatenate %137, %136 in 0 : vector<15x128xf32>, vector<1x128xf32> -> vector<16x128xf32>
    %139 = tpu.iota {dimensions = array<i32: 0>} : vector<16x1xi32>
    %c7_i32_44 = arith.constant 7 : i32
    %140 = vector.broadcast %c7_i32_44 : i32 to vector<16x1xi32>
    %141 = arith.andi %139, %140 : vector<16x1xi32>
    %c7_i32_45 = arith.constant 7 : i32
    %142 = vector.broadcast %c7_i32_45 : i32 to vector<16x1xi32>
    %143 = arith.cmpi ne, %141, %142 : vector<16x1xi32>
    %144 = arith.extui %143 : vector<16x1xi1> to vector<16x1xi32>
    %145 = arith.sitofp %144 : vector<16x1xi32> to vector<16x1xf32>
    %146 = vector.broadcast %145 : vector<16x1xf32> to vector<16x128xf32>
    %147 = arith.mulf %138, %146 : vector<16x128xf32>
    %148 = tpu.concatenate %135, %115, %147 in 1 : vector<16x128xf32>, vector<16x128xf32>, vector<16x128xf32> -> vector<16x384xf32>
    %149 = arith.truncf %148 : vector<16x384xf32> to vector<16x384xbf16>
    %c0_46 = arith.constant 0 : index
    %c0_47 = arith.constant 0 : index
    %150 = vector.load %arg8[%c0_46, %c0_47] : memref<384x128xbf16, #tpu.memory_space<vmem>>, vector<384x128xbf16>
    %cst_48 = arith.constant dense<0.000000e+00> : vector<16x128xf32>
    %151 = tpu.matmul %149, %150, %cst_48 {dimension_numbers = #tpu.dot_dimension_numbers<[1], [0], [0], [1], [0, 0, 1, 1], [], []>} : vector<16x384xbf16>, vector<384x128xbf16>, vector<16x128xf32> -> vector<16x128xf32>
    %152 = vector.extract_strided_slice %89 {offsets = [4, 0], sizes = [1, 128], strides = [1, 1]} : vector<6x128xf32> to vector<1x128xf32>
    %153 = vector.broadcast %152 : vector<1x128xf32> to vector<16x128xf32>
    %154 = arith.mulf %151, %153 : vector<16x128xf32>
    %155 = vector.extract_strided_slice %89 {offsets = [5, 0], sizes = [1, 128], strides = [1, 1]} : vector<6x128xf32> to vector<1x128xf32>
    %156 = vector.broadcast %155 : vector<1x128xf32> to vector<16x128xf32>
    %157 = arith.addf %154, %156 : vector<16x128xf32>
    %158 = arith.addf %157, %123 : vector<16x128xf32>
    %cst_49 = arith.constant 0.000000e+00 : f32
    %159 = vector.broadcast %cst_49 : f32 to vector<16x128xf32>
    %160 = arith.maximumf %158, %159 : vector<16x128xf32>
    %161 = arith.truncf %160 : vector<16x128xf32> to vector<16x128xbf16>
    %162 = arith.extf %161 : vector<16x128xbf16> to vector<16x128xf32>
    %c0_50 = arith.constant 0 : index
    %c0_51 = arith.constant 0 : index
    %163 = vector.load %arg18[%c0_50, %c0_51] : memref<16x128xf32, #tpu.memory_space<vmem>>, vector<16x128xf32>
    tpu.vector_store %arg18[%c0_50, %c0_51], %162 {strides = array<i32>} : memref<16x128xf32, #tpu.memory_space<vmem>>, vector<16x128xf32>,
    %c0_52 = arith.constant 0 : index
    %c0_53 = arith.constant 0 : index
    %164 = vector.load %arg13[%c0_52, %c0_53] : memref<6x128xf32, #tpu.memory_space<vmem>>, vector<6x128xf32>
    %c0_54 = arith.constant 0 : index
    %c0_55 = arith.constant 0 : index
    %165 = tpu.strided_load %arg18[%c0_54, %c0_55] {strides = array<i32: 2, 1>} : memref<16x128xf32, #tpu.memory_space<vmem>>, vector<8x128xf32>
    %c1_56 = arith.constant 1 : index
    %c0_57 = arith.constant 0 : index
    %166 = tpu.strided_load %arg18[%c1_56, %c0_57] {strides = array<i32: 2, 1>} : memref<16x128xf32, #tpu.memory_space<vmem>>, vector<8x128xf32>
    %cst_58 = arith.constant 0.000000e+00 : f32
    %167 = vector.broadcast %cst_58 : f32 to vector<1x128xf32>
    %168 = vector.extract_strided_slice %166 {offsets = [0, 0], sizes = [7, 128], strides = [1, 1]} : vector<8x128xf32> to vector<7x128xf32>
    %169 = tpu.concatenate %167, %168 in 0 : vector<1x128xf32>, vector<7x128xf32> -> vector<8x128xf32>
    %170 = tpu.iota {dimensions = array<i32: 0>} : vector<8x1xi32>
    %c3_i32 = arith.constant 3 : i32
    %171 = vector.broadcast %c3_i32 : i32 to vector<8x1xi32>
    %172 = arith.andi %170, %171 : vector<8x1xi32>
    %c0_i32_59 = arith.constant 0 : i32
    %173 = vector.broadcast %c0_i32_59 : i32 to vector<8x1xi32>
    %174 = arith.cmpi ne, %172, %173 : vector<8x1xi32>
    %175 = arith.extui %174 : vector<8x1xi1> to vector<8x1xi32>
    %176 = arith.sitofp %175 : vector<8x1xi32> to vector<8x1xf32>
    %177 = vector.broadcast %176 : vector<8x1xf32> to vector<8x128xf32>
    %178 = arith.mulf %169, %177 : vector<8x128xf32>
    %179 = tpu.concatenate %178, %165, %166 in 1 : vector<8x128xf32>, vector<8x128xf32>, vector<8x128xf32> -> vector<8x384xf32>
    %180 = arith.truncf %179 : vector<8x384xf32> to vector<8x384xbf16>
    %c0_60 = arith.constant 0 : index
    %c0_61 = arith.constant 0 : index
    %181 = vector.load %arg10[%c0_60, %c0_61] : memref<384x128xbf16, #tpu.memory_space<vmem>>, vector<384x128xbf16>
    %cst_62 = arith.constant dense<0.000000e+00> : vector<8x128xf32>
    %182 = tpu.matmul %180, %181, %cst_62 {dimension_numbers = #tpu.dot_dimension_numbers<[1], [0], [0], [1], [0, 0, 1, 1], [], []>} : vector<8x384xbf16>, vector<384x128xbf16>, vector<8x128xf32> -> vector<8x128xf32>
    %183 = vector.extract_strided_slice %164 {offsets = [0, 0], sizes = [1, 128], strides = [1, 1]} : vector<6x128xf32> to vector<1x128xf32>
    %184 = vector.broadcast %183 : vector<1x128xf32> to vector<8x128xf32>
    %185 = arith.mulf %182, %184 : vector<8x128xf32>
    %186 = vector.extract_strided_slice %164 {offsets = [1, 0], sizes = [1, 128], strides = [1, 1]} : vector<6x128xf32> to vector<1x128xf32>
    %187 = vector.broadcast %186 : vector<1x128xf32> to vector<8x128xf32>
    %188 = arith.addf %185, %187 : vector<8x128xf32>
    %cst_63 = arith.constant 0.000000e+00 : f32
    %189 = vector.broadcast %cst_63 : f32 to vector<8x128xf32>
    %190 = arith.maximumf %188, %189 : vector<8x128xf32>
    %c0_64 = arith.constant 0 : index
    %c0_65 = arith.constant 0 : index
    %191 = vector.load %arg11[%c0_64, %c0_65] : memref<384x128xbf16, #tpu.memory_space<vmem>>, vector<384x128xbf16>
    %cst_66 = arith.constant dense<0.000000e+00> : vector<8x128xf32>
    %192 = tpu.matmul %180, %191, %cst_66 {dimension_numbers = #tpu.dot_dimension_numbers<[1], [0], [0], [1], [0, 0, 1, 1], [], []>} : vector<8x384xbf16>, vector<384x128xbf16>, vector<8x128xf32> -> vector<8x128xf32>
    %193 = vector.extract_strided_slice %164 {offsets = [2, 0], sizes = [1, 128], strides = [1, 1]} : vector<6x128xf32> to vector<1x128xf32>
    %194 = vector.broadcast %193 : vector<1x128xf32> to vector<8x128xf32>
    %195 = arith.mulf %192, %194 : vector<8x128xf32>
    %196 = vector.extract_strided_slice %164 {offsets = [3, 0], sizes = [1, 128], strides = [1, 1]} : vector<6x128xf32> to vector<1x128xf32>
    %197 = vector.broadcast %196 : vector<1x128xf32> to vector<8x128xf32>
    %198 = arith.addf %195, %197 : vector<8x128xf32>
    %cst_67 = arith.constant 0.000000e+00 : f32
    %199 = vector.broadcast %cst_67 : f32 to vector<1x128xf32>
    %200 = vector.extract_strided_slice %190 {offsets = [0, 0], sizes = [7, 128], strides = [1, 1]} : vector<8x128xf32> to vector<7x128xf32>
    %201 = tpu.concatenate %199, %200 in 0 : vector<1x128xf32>, vector<7x128xf32> -> vector<8x128xf32>
    %202 = tpu.iota {dimensions = array<i32: 0>} : vector<8x1xi32>
    %c3_i32_68 = arith.constant 3 : i32
    %203 = vector.broadcast %c3_i32_68 : i32 to vector<8x1xi32>
    %204 = arith.andi %202, %203 : vector<8x1xi32>
    %c0_i32_69 = arith.constant 0 : i32
    %205 = vector.broadcast %c0_i32_69 : i32 to vector<8x1xi32>
    %206 = arith.cmpi ne, %204, %205 : vector<8x1xi32>
    %207 = arith.extui %206 : vector<8x1xi1> to vector<8x1xi32>
    %208 = arith.sitofp %207 : vector<8x1xi32> to vector<8x1xf32>
    %209 = vector.broadcast %208 : vector<8x1xf32> to vector<8x128xf32>
    %210 = arith.mulf %201, %209 : vector<8x128xf32>
    %cst_70 = arith.constant 0.000000e+00 : f32
    %211 = vector.broadcast %cst_70 : f32 to vector<1x128xf32>
    %212 = vector.extract_strided_slice %190 {offsets = [1, 0], sizes = [7, 128], strides = [1, 1]} : vector<8x128xf32> to vector<7x128xf32>
    %213 = tpu.concatenate %212, %211 in 0 : vector<7x128xf32>, vector<1x128xf32> -> vector<8x128xf32>
    %214 = tpu.iota {dimensions = array<i32: 0>} : vector<8x1xi32>
    %c3_i32_71 = arith.constant 3 : i32
    %215 = vector.broadcast %c3_i32_71 : i32 to vector<8x1xi32>
    %216 = arith.andi %214, %215 : vector<8x1xi32>
    %c3_i32_72 = arith.constant 3 : i32
    %217 = vector.broadcast %c3_i32_72 : i32 to vector<8x1xi32>
    %218 = arith.cmpi ne, %216, %217 : vector<8x1xi32>
    %219 = arith.extui %218 : vector<8x1xi1> to vector<8x1xi32>
    %220 = arith.sitofp %219 : vector<8x1xi32> to vector<8x1xf32>
    %221 = vector.broadcast %220 : vector<8x1xf32> to vector<8x128xf32>
    %222 = arith.mulf %213, %221 : vector<8x128xf32>
    %223 = tpu.concatenate %210, %190, %222 in 1 : vector<8x128xf32>, vector<8x128xf32>, vector<8x128xf32> -> vector<8x384xf32>
    %224 = arith.truncf %223 : vector<8x384xf32> to vector<8x384xbf16>
    %c0_73 = arith.constant 0 : index
    %c0_74 = arith.constant 0 : index
    %225 = vector.load %arg12[%c0_73, %c0_74] : memref<384x128xbf16, #tpu.memory_space<vmem>>, vector<384x128xbf16>
    %cst_75 = arith.constant dense<0.000000e+00> : vector<8x128xf32>
    %226 = tpu.matmul %224, %225, %cst_75 {dimension_numbers = #tpu.dot_dimension_numbers<[1], [0], [0], [1], [0, 0, 1, 1], [], []>} : vector<8x384xbf16>, vector<384x128xbf16>, vector<8x128xf32> -> vector<8x128xf32>
    %227 = vector.extract_strided_slice %164 {offsets = [4, 0], sizes = [1, 128], strides = [1, 1]} : vector<6x128xf32> to vector<1x128xf32>
    %228 = vector.broadcast %227 : vector<1x128xf32> to vector<8x128xf32>
    %229 = arith.mulf %226, %228 : vector<8x128xf32>
    %230 = vector.extract_strided_slice %164 {offsets = [5, 0], sizes = [1, 128], strides = [1, 1]} : vector<6x128xf32> to vector<1x128xf32>
    %231 = vector.broadcast %230 : vector<1x128xf32> to vector<8x128xf32>
    %232 = arith.addf %229, %231 : vector<8x128xf32>
    %233 = arith.addf %232, %198 : vector<8x128xf32>
    %cst_76 = arith.constant 0.000000e+00 : f32
    %234 = vector.broadcast %cst_76 : f32 to vector<8x128xf32>
    %235 = arith.maximumf %233, %234 : vector<8x128xf32>
    %c0_77 = arith.constant 0 : index
    %c0_78 = arith.constant 0 : index
    %236 = vector.load %arg19[%c0_77, %c0_78] : memref<8x128xf32, #tpu.memory_space<vmem>>, vector<8x128xf32>
    tpu.vector_store %arg19[%c0_77, %c0_78], %235 {strides = array<i32>} : memref<8x128xf32, #tpu.memory_space<vmem>>, vector<8x128xf32>,
    %c0_79 = arith.constant 0 : index
    %c0_80 = arith.constant 0 : index
    %237 = tpu.strided_load %arg19[%c0_79, %c0_80] {strides = array<i32: 4, 1>} : memref<8x128xf32, #tpu.memory_space<vmem>>, vector<2x128xf32>
    %c1_81 = arith.constant 1 : index
    %c0_82 = arith.constant 0 : index
    %238 = tpu.strided_load %arg19[%c1_81, %c0_82] {strides = array<i32: 4, 1>} : memref<8x128xf32, #tpu.memory_space<vmem>>, vector<2x128xf32>
    %c2 = arith.constant 2 : index
    %c0_83 = arith.constant 0 : index
    %239 = tpu.strided_load %arg19[%c2, %c0_83] {strides = array<i32: 4, 1>} : memref<8x128xf32, #tpu.memory_space<vmem>>, vector<2x128xf32>
    %c3 = arith.constant 3 : index
    %c0_84 = arith.constant 0 : index
    %240 = tpu.strided_load %arg19[%c3, %c0_84] {strides = array<i32: 4, 1>} : memref<8x128xf32, #tpu.memory_space<vmem>>, vector<2x128xf32>
    %241 = tpu.concatenate %237, %238, %239, %240 in 1 : vector<2x128xf32>, vector<2x128xf32>, vector<2x128xf32>, vector<2x128xf32> -> vector<2x512xf32>
    %c0_85 = arith.constant 0 : index
    %c0_86 = arith.constant 0 : index
    %242 = vector.load %arg14[%c0_85, %c0_86] : memref<512x128xf32, #tpu.memory_space<vmem>>, vector<512x128xf32>
    %cst_87 = arith.constant dense<0.000000e+00> : vector<2x128xf32>
    %243 = tpu.matmul %241, %242, %cst_87 {dimension_numbers = #tpu.dot_dimension_numbers<[1], [0], [0], [1], [0, 0, 1, 1], [], []>} : vector<2x512xf32>, vector<512x128xf32>, vector<2x128xf32> -> vector<2x128xf32>
    %c0_88 = arith.constant 0 : index
    %c0_89 = arith.constant 0 : index
    %244 = vector.load %arg15[%c0_88, %c0_89] : memref<1x128xf32, #tpu.memory_space<vmem>>, vector<1x128xf32>
    %245 = vector.broadcast %244 : vector<1x128xf32> to vector<2x128xf32>
    %246 = arith.addf %243, %245 : vector<2x128xf32>
    %c0_90 = arith.constant 0 : index
    %c0_91 = arith.constant 0 : index
    %c0_92 = arith.constant 0 : index
    %247 = vector.load %arg16[%c0_90, %c0_91, %c0_92] : memref<1x2x128xf32, #tpu.memory_space<vmem>>, vector<1x2x128xf32>
    %248 = vector.shape_cast %247 : vector<1x2x128xf32> to vector<2x128xf32>
    %249 = vector.shape_cast %246 : vector<2x128xf32> to vector<1x2x128xf32>
    tpu.vector_store %arg16[%c0_90, %c0_91, %c0_92], %249 {strides = array<i32>} : memref<1x2x128xf32, #tpu.memory_space<vmem>>, vector<1x2x128xf32>,
    return
  }
  func.func @transform_0(%arg0: i32) -> (i32, i32, i32) {
    %c0_i32 = arith.constant 0 : i32
    %c0_i32_0 = arith.constant 0 : i32
    %c0_i32_1 = arith.constant 0 : i32
    return %arg0, %c0_i32, %c0_i32_0 : i32, i32, i32
  }
  func.func @transform_1(%arg0: i32) -> (i32, i32) {
    %c0_i32 = arith.constant 0 : i32
    %c0_i32_0 = arith.constant 0 : i32
    %c0_i32_1 = arith.constant 0 : i32
    return %c0_i32, %c0_i32_0 : i32, i32
  }
  func.func @transform_2(%arg0: i32) -> (i32, i32) {
    %c0_i32 = arith.constant 0 : i32
    %c0_i32_0 = arith.constant 0 : i32
    %c0_i32_1 = arith.constant 0 : i32
    return %c0_i32, %c0_i32_0 : i32, i32
  }
  func.func @transform_3(%arg0: i32) -> (i32, i32) {
    %c0_i32 = arith.constant 0 : i32
    %c0_i32_0 = arith.constant 0 : i32
    %c0_i32_1 = arith.constant 0 : i32
    return %c0_i32, %c0_i32_0 : i32, i32
  }
  func.func @transform_4(%arg0: i32) -> (i32, i32) {
    %c0_i32 = arith.constant 0 : i32
    %c0_i32_0 = arith.constant 0 : i32
    %c0_i32_1 = arith.constant 0 : i32
    return %c0_i32, %c0_i32_0 : i32, i32
  }
  func.func @transform_5(%arg0: i32) -> (i32, i32) {
    %c0_i32 = arith.constant 0 : i32
    %c0_i32_0 = arith.constant 0 : i32
    %c0_i32_1 = arith.constant 0 : i32
    return %c0_i32, %c0_i32_0 : i32, i32
  }
  func.func @transform_6(%arg0: i32) -> (i32, i32) {
    %c0_i32 = arith.constant 0 : i32
    %c0_i32_0 = arith.constant 0 : i32
    %c0_i32_1 = arith.constant 0 : i32
    return %c0_i32, %c0_i32_0 : i32, i32
  }
  func.func @transform_7(%arg0: i32) -> (i32, i32) {
    %c0_i32 = arith.constant 0 : i32
    %c0_i32_0 = arith.constant 0 : i32
    %c0_i32_1 = arith.constant 0 : i32
    return %c0_i32, %c0_i32_0 : i32, i32
  }
  func.func @transform_8(%arg0: i32) -> (i32, i32) {
    %c0_i32 = arith.constant 0 : i32
    %c0_i32_0 = arith.constant 0 : i32
    %c0_i32_1 = arith.constant 0 : i32
    return %c0_i32, %c0_i32_0 : i32, i32
  }
  func.func @transform_9(%arg0: i32) -> (i32, i32) {
    %c0_i32 = arith.constant 0 : i32
    %c0_i32_0 = arith.constant 0 : i32
    %c0_i32_1 = arith.constant 0 : i32
    return %c0_i32, %c0_i32_0 : i32, i32
  }
  func.func @transform_10(%arg0: i32) -> (i32, i32) {
    %c0_i32 = arith.constant 0 : i32
    %c0_i32_0 = arith.constant 0 : i32
    %c0_i32_1 = arith.constant 0 : i32
    return %c0_i32, %c0_i32_0 : i32, i32
  }
  func.func @transform_11(%arg0: i32) -> (i32, i32) {
    %c0_i32 = arith.constant 0 : i32
    %c0_i32_0 = arith.constant 0 : i32
    %c0_i32_1 = arith.constant 0 : i32
    return %c0_i32, %c0_i32_0 : i32, i32
  }
  func.func @transform_12(%arg0: i32) -> (i32, i32) {
    %c0_i32 = arith.constant 0 : i32
    %c0_i32_0 = arith.constant 0 : i32
    %c0_i32_1 = arith.constant 0 : i32
    return %c0_i32, %c0_i32_0 : i32, i32
  }
  func.func @transform_13(%arg0: i32) -> (i32, i32) {
    %c0_i32 = arith.constant 0 : i32
    %c0_i32_0 = arith.constant 0 : i32
    %c0_i32_1 = arith.constant 0 : i32
    return %c0_i32, %c0_i32_0 : i32, i32
  }
  func.func @transform_14(%arg0: i32) -> (i32, i32) {
    %c0_i32 = arith.constant 0 : i32
    %c0_i32_0 = arith.constant 0 : i32
    %c0_i32_1 = arith.constant 0 : i32
    return %c0_i32, %c0_i32_0 : i32, i32
  }
  func.func @transform_15(%arg0: i32) -> (i32, i32, i32) {
    %c0_i32 = arith.constant 0 : i32
    %c0_i32_0 = arith.constant 0 : i32
    %c0_i32_1 = arith.constant 0 : i32
    return %arg0, %c0_i32, %c0_i32_0 : i32, i32, i32
  }
}

</mosaic_0001>

<bundles_post_ra>
// kernel: forward.1
= control target key start
LH: loop header
LB: loop body
LE: loop exit
PB: predicated region body
PF: predicated region fallthrough
CT: control target
= control target key end

     0   :  { %s5333_s0 = inlined_call_operand.vmem [shape: bf16[2,32,128], index: 0, kind: input, shape index: {}]   ;;  %s5334_s1 = inlined_call_operand.vmem [shape: bf16[384,128], index: 1, kind: input, shape index: {}]   ;;  %s5335_s2 = inlined_call_operand.vmem [shape: bf16[128,128], index: 2, kind: input, shape index: {}]   ;;  %s5336_s3 = inlined_call_operand.vmem [shape: bf16[384,128], index: 3, kind: input, shape index: {}]   ;;  %s5337_s4 = inlined_call_operand.vmem [shape: f32[6,128], index: 4, kind: input, shape index: {}]   ;;  %s5338_s5 = inlined_call_operand.vmem [shape: bf16[384,128], index: 5, kind: input, shape index: {}]   ;;  %s5339_s6 = inlined_call_operand.vmem [shape: bf16[384,128], index: 6, kind: input, shape index: {}]   ;;  %s5340_s7 = inlined_call_operand.vmem [shape: bf16[384,128], index: 7, kind: input, shape index: {}]   ;;  %s5341_s8 = inlined_call_operand.vmem [shape: f32[6,128], index: 8, kind: input, shape index: {}]   ;;  %s5342_s9 = inlined_call_operand.hbm [shape: bf16[384,128], index: 9, kind: input, shape index: {}]   ;;  %s5343_s10 = inlined_call_operand.hbm [shape: bf16[384,128], index: 10, kind: input, shape index: {}]   ;;  %s5344_s11 = inlined_call_operand.hbm [shape: bf16[384,128], index: 11, kind: input, shape index: {}]   ;;  %s5345_s12 = inlined_call_operand.vmem [shape: f32[6,128], index: 12, kind: input, shape index: {}]   ;;  %s5346_s13 = inlined_call_operand.vmem [shape: f32[512,128], index: 13, kind: input, shape index: {}]   ;;  %s5347_s14 = inlined_call_operand.vmem [shape: f32[1,128], index: 14, kind: input, shape index: {}]   ;;  %s5348_s15 = inlined_call_operand.hbm [shape: f32[2,2,128], index: 15, kind: output, shape index: {}]  }
   0x1   :  { %5357 = sst [smem:[#allocation22_spill]] %s5342_s9 }
   0x2   :  { %5358 = sst [smem:[#allocation23_spill]] %s5343_s10 }
   0x3   :  { %20 = vsyncpa [#allocation6], 0 }
   0x4   :  { %21 = vsyncpa [#allocation9], 0 }
   0x5   :  { %22 = vsyncpa [#allocation7], 0 }
   0x6   :  { %24 = vsyncpa [#allocation7 + $0x1], 0  ;;  %s4468_s18 = smov 0   ;;  %s4470_s19 = smov 0  }
   0x7   :  { %s4472_s20 = smov 0   ;;  %s4474_s21 = smov 0  }
   0x8 LB: > { %5359 = sst [smem:[#allocation15_spill]] %s4368_s18  ;;  %s4489_s22 = sadd.s32 4294967295, %s4380_s21   ;;  %s4380_s21 = sphi %s4474_s21, %s5376_s21   ;;  %s4376_s20 = sphi %s4472_s20, %s5378_s20   ;;  %s4372_s19 = sphi %s4470_s19, %s5380_s19   ;;  %s4368_s18 = sphi %s4468_s18, %s5379_s18  }
   0x9   : > { %5360 = sst [smem:[#allocation16_spill]] %s4376_s20  ;;  %s3108_s23 = sadd.s32 4294967294, %s4380_s21  }
   0xa   : > { %5361 = sst [smem:[#allocation17_spill]] %s4380_s21  ;;  %s4493_s24 = sadd.s32 1, %s4380_s21  }
   0xb   : > { %5362 = sst [smem:[#allocation18_spill]] %s4493_s24  ;;  %s357_s25 = sadd.s32 1, %s4376_s20 }
   0xc   : > { %s354_s26 = ssub.s32 %s4380_s21, %s4493_s24  ;;  %p367_p0 = scmp.ne.s32.totalorder %s4376_s20, %s4372_s19 }
   0xd   : > { %p355_p1 = scmp.eq.s32.totalorder %s354_s26, 0  ;;  %p368_p2 = scmp.eq.s32.totalorder %s4489_s22, 1 }
   0xe   : > { %p373_p3 = scmp.ne.s32.totalorder %s4372_s19, %s4368_s18  ;;  %p374_p4 = scmp.eq.s32.totalorder %s3108_s23, 1 }
   0xf   : > { %s4504_s27 = scalar_select %p355_p1, %s4376_s20, %s357_s25  }
  0x10   : > { %p4506_p5 = por %p368_p2, %p367_p0  ;;  %p4510_p6 = por %p374_p4, %p373_p3 }
  0x11   : > { %5363 = sst [smem:[#allocation19_spill]] %s4504_s27  ;;  %p3109_p7 = scmp.ge.s32.totalorder %s4380_s21, 1 }
  0x12   : > { %s5364_s28 = scalar_select %p4506_p5, 1, 0 }
  0x13   : > { %s5366_s29 = scalar_select %p4510_p6, 1, 0 }
  0x14   : > { %5365 = sst [smem:[#allocation20_spill]] %s5364_s28  ;;  %p381_p8 = scmp.lt.s32.totalorder %s4380_s21, 3 }
  0x15   : > { %5367 = sst [smem:[#allocation21_spill]] %s5366_s29  ;;  %p4174_p9 = scmp.eq.s32.totalorder %s4489_s22, 0 }
  0x16   : > { %p4517_p10 = pnand %p3109_p7, %p381_p8  ;;  %s5369_s10 = sld [smem:[#allocation23_spill]] }
  0x17   : > { %s5370_s9 = sld [smem:[#allocation22_spill]]  ;;  %s4382_s24 = smov [#allocation8]  }
  0x18   : > { %p4160_p11 = pneg %p4517_p10  ;;  %s432_s29 = sshll.u32 %s4382_s24, 4  ;;  %s433_s29 = int_to_ptr.vmem [resolvable:$true] %s432_s29 }
  0x19   : > { %s4383_s16 = smov 64   ;;  %s4384_s17 = smov 4  }
  0x1a   : > { %p4531_p12 = pnand %p4174_p9, %p4160_p11  ;;  %s4386_s21 = smov [#allocation10]  }
  0x1b   : > { %s446_s28 = sshll.u32 %s4386_s21, 4  ;;  %s447_s28 = int_to_ptr.vmem [resolvable:$true] %s446_s28 }
  0x1c   : > { %s430_s23 = sshll.u32 %s5369_s10, 4  ;;  %s4385_s10 = smov [#allocation5]   ;;  %s431_s23 = int_to_ptr.hbm [resolvable:$true] %s430_s23 }
  0x1d   : > { %s416_s27 = sshll.u32 %s5370_s9, 4  ;;  %s418_s18 = sshll.u32 %s4385_s10, 4  ;;  %s417_s27 = int_to_ptr.hbm [resolvable:$true] %s416_s27  ;;  %s419_s18 = int_to_ptr.vmem [resolvable:$true] %s418_s18 }
  0x1e   : > { %4166 = dma.hbm_to_vmem [thread:$0]  (!%p4531_p12), %s431_s23, 3072, %s433_s29, [#allocation9], %s4383_s16, %s4383_s16, %s4384_s17  }
  0x1f   : > { %s444_s9 = sshll.u32 %s5344_s11, 4  ;;  %479 = sbr.rel (%p4517_p10) target bundleno = 1183 (0x49f), region = 80  ;;  %s445_s9 = int_to_ptr.hbm [resolvable:$true] %s444_s9 }
  0x20   : > { %4163 = dma.hbm_to_vmem [thread:$0]  (!%p4531_p12), %s417_s27, 3072, %s419_s18, [#allocation6], %s4383_s16, %s4383_s16, %s4384_s17  }
  0x21   : > { %4169 = dma.hbm_to_vmem [thread:$0]  (!%p4531_p12), %s445_s9, 3072, %s447_s28, [#allocation9], %s4383_s16, %s4383_s16, %s4384_s17  }
  0x24   : > { %4355 = dma.done.wait (%p4174_p9), [#allocation6], 3072  }
  0x25   : > { %4357 = vsyncadd (%p4174_p9), [#allocation6], 4294964224 }
  0x26   : > { %4359 = dma.done.wait (%p4174_p9), [#allocation9], 6144  }
  0x27   : > { %4361 = vsyncadd (%p4174_p9), [#allocation9], 4294961152  ;;  %p538_p13 = scmp.lt.s32.totalorder %s4489_s22, 1  ;;  %v3953_v0 = vld [vmem:[%s5334_s1 + $0x38] sm:$0xff]  ;;  %v3952_v3 = vld [vmem:[%s5334_s1 + $0x30] sm:$0xff]  ;;  %v569_v6 = vlaneseq  ;;  %vm556_vm0 = vcmask 1040384  }
  0x28   : > { %v3961_v1 = vld [vmem:[%s5334_s1 + $0x78] sm:$0xff]  ;;  %821 = vmatpush.bf16.msra.mxu0 %v3953_v0  ;;  %v3960_v4 = vld [vmem:[%s5334_s1 + $0x70] sm:$0xff]  ;;  %v3951_v7 = vld [vmem:[%s5334_s1 + $0x28] sm:$0xff]  ;;  %vm594_vm2 = vcmask 1046528   ;;  %v4387_v35 = vmov 0.0   ;;  %s535_s16 = sand.u32 1, %s4372_s19  }
  0x29   : > { %v3969_v2 = vld [vmem:[%s5334_s1 + $0xb8] sm:$0xff]  ;;  %s539_s27 = scalar_select %p538_p13, %s4489_s22, 1  ;;  %840 = vmatpush.bf16.msra.mxu1 %v3961_v1  ;;  %v3968_v5 = vld [vmem:[%s5334_s1 + $0xb0] sm:$0xff]  ;;  %v3959_v8 = vld [vmem:[%s5334_s1 + $0x68] sm:$0xff]  ;;  %v4588_v10 = vshrl.u32 %v569_v6, 7 }
  0x2a   : > { %859 = vmatpush.bf16.msra.mxu2 %v3969_v2  ;;  %v3967_v9 = vld [vmem:[%s5334_s1 + $0xa8] sm:$0xff]  ;;  %v3950_v11 = vld [vmem:[%s5334_s1 + $0x20] sm:$0xff]  ;;  %v3949_v17 = vld [vmem:[%s5334_s1 + $0x18] sm:$0xff]  ;;  %s3940_s10 = sshll.u32 %s4489_s22, 1  ;;  %s4330_s26 = scalar_lea.hbm %s5348_s15, 4 }
  0x2b   : > { %s3943_s25 = sshll.u32 %s539_s27, 4  ;;  %v3958_v12 = vld [vmem:[%s5334_s1 + $0x60] sm:$0xff]  ;;  %v4606_v16 = vadd.s32 8, %v4588_v10  ;;  %v3957_v18 = vld [vmem:[%s5334_s1 + $0x58] sm:$0xff]  ;;  %v574_v22 = vand.u32 15, %v4588_v10  ;;  %v3948_v25 = vld [vmem:[%s5334_s1 + $0x10] sm:$0xff]  ;;  %s3013_s20 = scalar_lea.hbm %s5348_s15, %s3940_s10 }
  0x2c   : > { %822 = vmatpush.bf16.msra.mxu0 %v3952_v3  ;;  %s4586_s29 = scalar_lea.vmem %s5333_s0, %s3943_s25  ;;  %v3966_v13 = vld [vmem:[%s5334_s1 + $0xa0] sm:$0xff]  ;;  %v3965_v20 = vld [vmem:[%s5334_s1 + $0x98] sm:$0xff]  ;;  %v3956_v26 = vld [vmem:[%s5334_s1 + $0x50] sm:$0xff]  ;;  %v572_v48 = vadd.s32 16, %v4588_v10  ;;  %v573_v50 = vadd.s32 24, %v4588_v10  ;;  %s3118_s25 = sshll.u32 %s535_s16, 1 }
  0x2d   : > { %841 = vmatpush.bf16.msra.mxu1 %v3960_v4  ;;  %v4600_v14 = vld [vmem:[%s4586_s29] sm:$0xff]   ;;  %v4603_v15 = vld [vmem:[%s4586_s29 + $0x8] sm:$0xff]   ;;  %v575_v24 = vand.u32 15, %v4606_v16  ;;  %v3964_v28 = vld [vmem:[%s5334_s1 + $0x90] sm:$0xff]  ;;  %vm578_vm1 = vcmp.ne.s32.totalorder %v574_v22, 0  ;;  %s3017_s28 = sshll.u32 %s3013_s20, 4  ;;  %s3018_s28 = int_to_ptr.hbm [resolvable:$true] %s3017_s28 }
  0x2e   : > { %860 = vmatpush.bf16.msra.mxu2 %v3968_v5  ;;  %v547_v19 = vunpack.c.l.bf16 %v4600_v14  ;;  %v548_v21 = vunpack.c.h.bf16 %v4600_v14  ;;  %v549_v23 = vunpack.c.l.bf16 %v4603_v15  ;;  %v3947_v31 = vld [vmem:[%s5334_s1 + $0x8] sm:$0xff]  ;;  %v4639_v36 = vsel %vm578_vm1, 1.0, %v4387_v35  ;;  %v3946_v42 = vld [vmem:[%s5334_s1] sm:$0xff]  ;;  %v3993_v49 = vld [vmem:[%s5336_s3 + $0x78] sm:$0xff]  ;;  %s3003_s27 = scalar_lea.sflag [#allocation7], %s535_s16  ;;  %s4324_s22 = sshra.s32 %s3018_s28, 4  ;;  %s4325_s22 = int_to_ptr.hbm [resolvable:$true] %s4324_s22 }
  0x2f   : > { %vm608_vm3 = vcmp.ne.s32.totalorder %v575_v24, 15  ;;  %v3955_v32 = vld [vmem:[%s5334_s1 + $0x48] sm:$0xff]  ;;  %v3954_v43 = vld [vmem:[%s5334_s1 + $0x40] sm:$0xff]  ;;  %v3985_v51 = vld [vmem:[%s5336_s3 + $0x38] sm:$0xff]  ;;  %v550_v54 = vunpack.c.h.bf16 %v4603_v15  ;;  %v576_v55 = vand.u32 15, %v572_v48  ;;  %v577_v57 = vand.u32 15, %v573_v50  ;;  %p4331_p3 = scmp.lt.s32.totalorder %s4325_s22, %s5348_s15 }
  0x30   : > { %823 = vmatpush.bf16.msra.mxu0 %v3951_v7  ;;  %v557_v27 = vrot.slane %v547_v19, 7  ;;  %v596_v29 = vrot.slane %v548_v21, 1  ;;  %v598_v30 = vrot.slane %v549_v23, 1  ;;  %v558_v33 = vrot.slane %v548_v21, 7  ;;  %v3963_v37 = vld [vmem:[%s5334_s1 + $0x88] sm:$0xff]  ;;  %v3962_v46 = vld [vmem:[%s5334_s1 + $0x80] sm:$0xff] }
  0x31   : > { %842 = vmatpush.bf16.msra.mxu1 %v3959_v8  ;;  %v595_v38 = vrot.slane %v547_v19, 1  ;;  %v4646_v40 = vsel %vm608_vm3, 1.0, %v4387_v35  ;;  %v3992_v56 = vld [vmem:[%s5336_s3 + $0x70] sm:$0xff]  ;;  %v560_v58 = vrot.slane %v549_v23, 7  ;;  %vm580_vm4 = vcmp.ne.s32.totalorder %v576_v55, 0  ;;  %v3977_v7 = vld [vmem:[%s5335_s2 + $0x38] sm:$0xff] }
  0x32   : > { %861 = vmatpush.bf16.msra.mxu2 %v3967_v9  ;;  %v568_v34 = vsel %vm556_vm0, 0.0, %v557_v27  ;;  %v599_v39 = vsel %vm594_vm2, %v596_v29, %v598_v30  ;;  %v559_v44 = vsel %vm556_vm0, %v557_v27, %v558_v33  ;;  %v600_v59 = vrot.slane %v550_v54, 1  ;;  %v3984_v8 = vld [vmem:[%s5336_s3 + $0x30] sm:$0xff]  ;;  %v3991_v9 = vld [vmem:[%s5336_s3 + $0x68] sm:$0xff]  ;;  %968 = vmatpush.bf16.msra.mxu3 %v3977_v7  ;;  %v3981_v21 = vld [vmem:[%s5336_s3 + $0x18] sm:$0xff]  ;;  %s4326_s30 = scalar_lea.hbm %s4325_s22, 2 }
  0x33   : > { %v590_v41 = vmul.f32 %v4639_v36, %v568_v34  ;;  %v620_v45 = vmul.f32 %v4646_v40, %v599_v39  ;;  %v597_v47 = vsel %vm594_vm2, %v595_v38, %v596_v29  ;;  %vm610_vm5 = vcmp.ne.s32.totalorder %v577_v57, 15  ;;  %v4000_v19 = vld [vmem:[%s5336_s3 + $0xb0] sm:$0xff]  ;;  %v3999_v23 = vld [vmem:[%s5336_s3 + $0xa8] sm:$0xff]  ;;  %v3973_v24 = vld [vmem:[%s5335_s2 + $0x18] sm:$0xff]  ;;  %p4327_p0 = scmp.ne.s32.totalorder %s4325_s22, %s4326_s30  ;;  %p4332_p4 = scmp.lt.s32.totalorder %s4330_s26, %s4326_s30 }
  0x34   : > { %824 = vmatpush.bf16.msra.mxu0 %v3950_v11  ;;  %v561_v60 = vsel %vm556_vm0, %v558_v33, %v560_v58  ;;  %v562_v61 = vrot.slane %v550_v54, 7  ;;  %v4676_v62 = vsel %vm580_vm4, 1.0, %v4387_v35  ;;  %v606_v63 = vsel %vm594_vm2, %v600_v59, 0.0  ;;  %v3976_v11 = vld [vmem:[%s5335_s2 + $0x30] sm:$0xff]  ;;  %v3998_v27 = vld [vmem:[%s5336_s3 + $0xa0] sm:$0xff]  ;;  %v3979_v29 = vld [vmem:[%s5336_s3 + $0x8] sm:$0xff] }
  0x35   : > { %843 = vmatpush.bf16.msra.mxu1 %v3958_v12  ;;  %v623_v52 = vpack.c.bf16 %v559_v44, %v590_v41  ;;  %v625_v53 = vpack.c.bf16 %v620_v45, %v597_v47  ;;  %v4680_v0 = vsel %vm610_vm5, 1.0, %v4387_v35  ;;  %v592_v1 = vmul.f32 %v4676_v62, %v561_v60  ;;  %v3983_v12 = vld [vmem:[%s5336_s3 + $0x28] sm:$0xff]  ;;  %v3988_v22 = vld [vmem:[%s5336_s3 + $0x50] sm:$0xff]  ;;  %v3978_v33 = vld [vmem:[%s5336_s3] sm:$0xff]  ;;  %p4328_p1 = pnand %p4327_p0, %p4506_p5  ;;  %p4333_p7 = por %p4332_p4, %p4331_p3 }
  0x36   : > { %862 = vmatpush.bf16.msra.mxu2 %v3966_v13  ;;  %v563_v2 = vsel %vm556_vm0, %v560_v58, %v562_v61  ;;  %v622_v3 = vmul.f32 %v4680_v0, %v606_v63  ;;  %v601_v4 = vsel %vm594_vm2, %v598_v30, %v600_v59  ;;  %v3990_v13 = vld [vmem:[%s5336_s3 + $0x60] sm:$0xff]  ;;  %969 = vmatpush.bf16.msra.mxu3 %v3976_v11  ;;  %v3996_v34 = vld [vmem:[%s5336_s3 + $0x90] sm:$0xff]  ;;  %v3995_v38 = vld [vmem:[%s5336_s3 + $0x88] sm:$0xff] }
  0x37   : > { %v626_v5 = vpack.c.bf16 %v563_v2, %v592_v1  ;;  %v3986_v30 = vld [vmem:[%s5336_s3 + $0x40] sm:$0xff]  ;;  %v3945_v54 = vld [vmem:[%s4586_s29 + $0x8] sm:$0xff]  ;;  %p4329_p2 = pneg %p4328_p1 }
  0x38   : > { %825 = vmatpush.bf16.msra.mxu0 %v3949_v17  ;;  %v628_v6 = vpack.c.bf16 %v622_v3, %v601_v4  ;;  %v3982_v17 = vld [vmem:[%s5336_s3 + $0x20] sm:$0xff] }
  0x39   : > { %844 = vmatpush.bf16.msra.mxu1 %v3957_v18  ;;  %v3989_v18 = vld [vmem:[%s5336_s3 + $0x58] sm:$0xff]  ;;  %v3944_v39 = vld [vmem:[%s4586_s29] sm:$0xff]  ;;  %s537_s29 = scalar_lea.vmem [#allocation11], %s3118_s25  ;;  %p4334_p8 = pnand %p4333_p7, %p4329_p2 }
  0x3a   : > { %863 = vmatpush.bf16.msra.mxu2 %v3965_v20  ;;  %v3974_v20 = vld [vmem:[%s5335_s2 + $0x20] sm:$0xff]  ;;  %s3015_s24 = sshll.u32 %s537_s29, 4  ;;  %s3016_s24 = int_to_ptr.vmem [resolvable:$true] %s3015_s24 }
  0x3b   : > { %v4778_v44 = vld [vmem:[%s5337_s4] sm:$0x3f] }
  0x3c   : > { %826 = vmatpush.bf16.msra.mxu0 %v3948_v25  ;;  %v3980_v25 = vld [vmem:[%s5336_s3 + $0x10] sm:$0xff] }
  0x3d   : > { %845 = vmatpush.bf16.msra.mxu1 %v3956_v26  ;;  %v3987_v26 = vld [vmem:[%s5336_s3 + $0x48] sm:$0xff] }
  0x3e   : > { %864 = vmatpush.bf16.msra.mxu2 %v3964_v28  ;;  %v3972_v28 = vld [vmem:[%s5335_s2 + $0x10] sm:$0xff] }
  0x40   : > { %827 = vmatpush.bf16.msra.mxu0 %v3947_v31  ;;  %v3997_v31 = vld [vmem:[%s5336_s3 + $0x98] sm:$0xff] }
  0x41   : > { %846 = vmatpush.bf16.msra.mxu1 %v3955_v32  ;;  %v3971_v32 = vld [vmem:[%s5335_s2 + $0x8] sm:$0xff] }
  0x42   : > { %865 = vmatpush.bf16.msra.mxu2 %v3963_v37  ;;  %v3970_v37 = vld [vmem:[%s5335_s2] sm:$0xff] }
  0x44   : > { %828 = vmatpush.bf16.msra.mxu0 %v3946_v42 }
  0x45   : > { %847 = vmatpush.bf16.msra.mxu1 %v3954_v43  ;;  %v3994_v43 = vld [vmem:[%s5336_s3 + $0x80] sm:$0xff] }
  0x46   : > { %866 = vmatpush.bf16.msra.mxu2 %v3962_v46  ;;  %v878_v46 = vperm.slane %v4778_v44, 0 }
  0x47   : > { %829 = vmatmul.bf16.vlgmr.msra.gmra.mxu0 %v623_v52 }
  0x48   : > { %1231 = vmatpush.bf16.msrb.mxu0 %v3985_v51  ;;  %848 = vmatmul.bf16.vlgmr.msra.gmra.mxu1 %v4600_v14  ;;  %v4001_v14 = vld [vmem:[%s5336_s3 + $0xb8] sm:$0xff] }
  0x49   : > { %1250 = vmatpush.bf16.msrb.mxu1 %v3993_v49  ;;  %867 = vmatmul.bf16.vlgmr.msra.gmra.mxu2 %v625_v53  ;;  %v883_v49 = vperm.slane %v4778_v44, 1 }
  0x4a   : > { %1269 = vmatpush.bf16.msrb.mxu2 %v4001_v14 }
  0x4c   : > { %1232 = vmatpush.bf16.msrb.mxu0 %v3984_v8 }
  0x4d   : > { %1251 = vmatpush.bf16.msrb.mxu1 %v3992_v56 }
  0x4e   : > { %1270 = vmatpush.bf16.msrb.mxu2 %v4000_v19 }
  0x50   : > { %1233 = vmatpush.bf16.msrb.mxu0 %v3983_v12 }
  0x51   : > { %1252 = vmatpush.bf16.msrb.mxu1 %v3991_v9 }
  0x52   : > { %1271 = vmatpush.bf16.msrb.mxu2 %v3999_v23 }
  0x54   : > { %1234 = vmatpush.bf16.msrb.mxu0 %v3982_v17 }
  0x55   : > { %1253 = vmatpush.bf16.msrb.mxu1 %v3990_v13 }
  0x56   : > { %1272 = vmatpush.bf16.msrb.mxu2 %v3998_v27 }
  0x57   : > { %834 = vmatmul.bf16.gmra.mxu0 %v626_v5 }
  0x58   : > { %853 = vmatmul.bf16.gmra.mxu1 %v4603_v15  ;;  %v3975_v15 = vld [vmem:[%s5335_s2 + $0x28] sm:$0xff]  ;;  %1235 = vmatpush.bf16.msrb.mxu0 %v3981_v21 }
  0x59   : > { %872 = vmatmul.bf16.gmra.mxu2 %v628_v6  ;;  %970 = vmatpush.bf16.msra.mxu3 %v3975_v15 }
  0x5a   : > { %1254 = vmatpush.bf16.msrb.mxu1 %v3989_v18  ;;  %1273 = vmatpush.bf16.msrb.mxu2 %v3997_v31 }
  0x5c   : > { %1236 = vmatpush.bf16.msrb.mxu0 %v3980_v25 }
  0x5d   : > { %971 = vmatpush.bf16.msra.mxu3 %v3974_v20 }
  0x5e   : > { %1255 = vmatpush.bf16.msrb.mxu1 %v3988_v22  ;;  %1274 = vmatpush.bf16.msrb.mxu2 %v3996_v34 }
  0x60   : > { %1237 = vmatpush.bf16.msrb.mxu0 %v3979_v29 }
  0x61   : > { %972 = vmatpush.bf16.msra.mxu3 %v3973_v24 }
  0x62   : > { %1256 = vmatpush.bf16.msrb.mxu1 %v3987_v26  ;;  %1275 = vmatpush.bf16.msrb.mxu2 %v3995_v38 }
  0x64   : > { %1238 = vmatpush.bf16.msrb.mxu0 %v3978_v33 }
  0x65   : > { %973 = vmatpush.bf16.msra.mxu3 %v3972_v28 }
  0x66   : > { %1257 = vmatpush.bf16.msrb.mxu1 %v3986_v30  ;;  %1276 = vmatpush.bf16.msrb.mxu2 %v3994_v43 }
  0x69   : > { %974 = vmatpush.bf16.msra.mxu3 %v3971_v32 }
  0x6d   : > { %975 = vmatpush.bf16.msra.mxu3 %v3970_v37 }
  0x70   : > { %976 = vmatmul.bf16.vlgmr.msra.gmra.mxu3 %v3944_v39 }
  0x80   : > { %981 = vmatmul.bf16.gmra.mxu3 %v3945_v54  ;;  %v4024_v54 = vld [vmem:[%s5338_s5 + $0xb0] sm:$0xff] }
  0xc4   : > { %v830_v41 = vpop.f32.mrf.mxu0 }
  0xc5   : > { %v849_v42 = vpop.f32.mrf.mxu1 }
  0xc6   : > { %v850_v45 = vadd.f32 %v849_v42, %v830_v41 }
  0xcc   : > { %v868_v47 = vpop.f32.mrf.mxu2  ;;  %v832_v50 = vpop.f32.mrf.mxu0 }
  0xcd   : > { %v869_v48 = vadd.f32 %v868_v47, %v850_v45  ;;  %v851_v51 = vpop.f32.mrf.mxu1  ;;  %v4009_v47 = vld [vmem:[%s5338_s5 + $0x38] sm:$0xff] }
  0xce   : > { %v852_v56 = vadd.f32 %v851_v51, %v832_v50  ;;  %1539 = vmatpush.bf16.msrb.mxu3 %v4009_v47  ;;  %v4007_v50 = vld [vmem:[%s5338_s5 + $0x28] sm:$0xff]  ;;  %v4025_v51 = vld [vmem:[%s5338_s5 + $0xb8] sm:$0xff] }
  0xcf   : > { %v879_v52 = vmul.f32 %v878_v46, %v869_v48  ;;  %v4008_v48 = vld [vmem:[%s5338_s5 + $0x30] sm:$0xff]  ;;  %1567 = vmatpush.bf16.msra.mxu1 %v4025_v51 }
  0xd1   : > { %v884_v53 = vadd.f32 %v883_v49, %v879_v52  ;;  %v4013_v52 = vld [vmem:[%s5338_s5 + $0x58] sm:$0xff] }
  0xd2   : > { %1540 = vmatpush.bf16.msrb.mxu3 %v4008_v48  ;;  %v4039_v48 = vld [vmem:[%s5339_s6 + $0x68] sm:$0xff] }
  0xd3   : > { %v888_v55 = vmax.f32 %v884_v53, 0.0  ;;  %v4006_v53 = vld [vmem:[%s5338_s5 + $0x20] sm:$0xff]  ;;  %1568 = vmatpush.bf16.msra.mxu1 %v4024_v54 }
  0xd4   : > { %v870_v57 = vpop.f32.mrf.mxu2  ;;  %v835_v59 = vpop.f32.mrf.mxu0 }
  0xd5   : > { %v871_v58 = vadd.f32 %v870_v57, %v852_v56  ;;  %v854_v60 = vpop.f32.mrf.mxu1  ;;  %v1001_v63 = vrot.slane %v888_v55, 7  ;;  %v1017_v25 = vrot.slane %v888_v55, 1  ;;  %v4012_v57 = vld [vmem:[%s5338_s5 + $0x50] sm:$0xff] }
  0xd6   : > { %v855_v2 = vadd.f32 %v854_v60, %v835_v59  ;;  %1541 = vmatpush.bf16.msrb.mxu3 %v4007_v50  ;;  %v4005_v60 = vld [vmem:[%s5338_s5 + $0x18] sm:$0xff] }
  0xd7   : > { %v880_v61 = vmul.f32 %v878_v46, %v871_v58  ;;  %v1012_v4 = vsel %vm556_vm0, 0.0, %v1001_v63 }
  0xd8   : > { %v1013_v9 = vmul.f32 %v4639_v36, %v1012_v4  ;;  %v4022_v4 = vld [vmem:[%s5338_s5 + $0xa0] sm:$0xff] }
  0xd9   : > { %v885_v1 = vadd.f32 %v883_v49, %v880_v61  ;;  %v4023_v61 = vld [vmem:[%s5338_s5 + $0xa8] sm:$0xff] }
  0xda   : > { %1542 = vmatpush.bf16.msrb.mxu3 %v4006_v53  ;;  %1569 = vmatpush.bf16.msra.mxu1 %v4023_v61 }
  0xdb   : > { %v889_v3 = vmax.f32 %v885_v1, 0.0  ;;  %v4844_v1 = vperm.slane %v4778_v44, 2 }
  0xdc   : > { %v873_v5 = vpop.f32.mrf.mxu2  ;;  %v837_v13 = vpop.f32.mrf.mxu0 }
  0xdd   : > { %v874_v6 = vadd.f32 %v873_v5, %v855_v2  ;;  %v1034_v7 = vpack.c.bf16 %v889_v3, %v888_v55  ;;  %v1002_v8 = vrot.slane %v889_v3, 7  ;;  %v856_v14 = vpop.f32.mrf.mxu1  ;;  %v1018_v23 = vrot.slane %v889_v3, 1  ;;  %v4033_v55 = vld [vmem:[%s5339_s6 + $0x38] sm:$0xff]  ;;  %v4011_v2 = vld [vmem:[%s5338_s5 + $0x48] sm:$0xff]  ;;  %v4004_v3 = vld [vmem:[%s5338_s5 + $0x10] sm:$0xff] }
  0xde   : > { %v857_v19 = vadd.f32 %v856_v14, %v837_v13  ;;  %1781 = vmatpush.bf16.msra.mxu2 %v4033_v55  ;;  %1543 = vmatpush.bf16.msrb.mxu3 %v4005_v60  ;;  %v4031_v5 = vld [vmem:[%s5339_s6 + $0x28] sm:$0xff]  ;;  %v4038_v60 = vld [vmem:[%s5339_s6 + $0x60] sm:$0xff] }
  0xdf   : > { %v881_v11 = vmul.f32 %v878_v46, %v874_v6  ;;  %1258 = vmatmul.bf16.vlgmr.msrb.gmra.mxu1 %v1034_v7  ;;  %v1003_v12 = vsel %vm556_vm0, %v1001_v63, %v1002_v8  ;;  %v1019_v29 = vsel %vm594_vm2, %v1017_v25, %v1018_v23  ;;  %v4032_v63 = vld [vmem:[%s5339_s6 + $0x30] sm:$0xff]  ;;  %v4003_v14 = vld [vmem:[%s5338_s5 + $0x8] sm:$0xff] }
  0xe0   : > { %v1033_v15 = vpack.c.bf16 %v1003_v12, %v1013_v9  ;;  %1570 = vmatpush.bf16.msra.mxu1 %v4022_v4  ;;  %v4863_v9 = vperm.slane %v4778_v44, 4  ;;  %v4020_v25 = vld [vmem:[%s5338_s5 + $0x90] sm:$0xff] }
  0xe1   : > { %v886_v17 = vadd.f32 %v883_v49, %v881_v11  ;;  %v4010_v11 = vld [vmem:[%s5338_s5 + $0x40] sm:$0xff]  ;;  %v4044_v4 = vld [vmem:[%s5339_s6 + $0x90] sm:$0xff] }
  0xe2   : > { %1239 = vmatmul.bf16.vlgmr.msrb.gmra.mxu0 %v1033_v15  ;;  %1782 = vmatpush.bf16.msra.mxu2 %v4032_v63  ;;  %v4021_v15 = vld [vmem:[%s5338_s5 + $0x98] sm:$0xff] }
  0xe3   : > { %v890_v18 = vmax.f32 %v886_v17, 0.0  ;;  %1544 = vmatpush.bf16.msrb.mxu3 %v4004_v3  ;;  %v4049_v17 = vld [vmem:[%s5339_s6 + $0xb8] sm:$0xff] }
  0xe4   : > { %v875_v20 = vpop.f32.mrf.mxu2  ;;  %1571 = vmatpush.bf16.msra.mxu1 %v4021_v15  ;;  %v4043_v15 = vld [vmem:[%s5339_s6 + $0x88] sm:$0xff] }
  0xe5   : > { %v1020_v21 = vrot.slane %v890_v18, 1  ;;  %v876_v22 = vadd.f32 %v875_v20, %v857_v19  ;;  %v1004_v36 = vrot.slane %v890_v18, 7  ;;  %v4878_v19 = vperm.slane %v4778_v44, 5  ;;  %v4030_v20 = vld [vmem:[%s5339_s6 + $0x20] sm:$0xff] }
  0xe6   : > { %1783 = vmatpush.bf16.msra.mxu2 %v4031_v5 }
  0xe7   : > { %v882_v24 = vmul.f32 %v878_v46, %v876_v22  ;;  %v1021_v26 = vsel %vm594_vm2, %v1018_v23, %v1020_v21  ;;  %v1005_v32 = vsel %vm556_vm0, %v1002_v8, %v1004_v36  ;;  %v4017_v46 = vld [vmem:[%s5338_s5 + $0x78] sm:$0xff]  ;;  %v4860_v8 = vperm.slane %v4778_v44, 3  ;;  %1545 = vmatpush.bf16.msrb.mxu3 %v4003_v14  ;;  %v4002_v44 = vld [vmem:[%s5338_s5] sm:$0xff] }
  0xe8   : > { %v1030_v27 = vmul.f32 %v4646_v40, %v1021_v26  ;;  %v1015_v37 = vmul.f32 %v4676_v62, %v1005_v32  ;;  %1553 = vmatpush.bf16.msra.mxu0 %v4017_v46  ;;  %v4016_v62 = vld [vmem:[%s5338_s5 + $0x70] sm:$0xff]  ;;  %1572 = vmatpush.bf16.msra.mxu1 %v4020_v25  ;;  %v4047_v32 = vld [vmem:[%s5339_s6 + $0xa8] sm:$0xff]  ;;  %v4046_v46 = vld [vmem:[%s5339_s6 + $0xa0] sm:$0xff] }
  0xe9   : > { %v887_v28 = vadd.f32 %v883_v49, %v882_v24  ;;  %v4014_v49 = vld [vmem:[%s5338_s5 + $0x60] sm:$0xff]  ;;  %v4048_v26 = vld [vmem:[%s5339_s6 + $0xb0] sm:$0xff]  ;;  %v4035_v25 = vld [vmem:[%s5339_s6 + $0x48] sm:$0xff] }
  0xea   : > { %v1035_v30 = vpack.c.bf16 %v1030_v27, %v1019_v29  ;;  %1784 = vmatpush.bf16.msra.mxu2 %v4030_v20  ;;  %v4029_v27 = vld [vmem:[%s5339_s6 + $0x18] sm:$0xff] }
  0xeb   : > { %v891_v31 = vmax.f32 %v887_v28, 0.0  ;;  %v4041_v28 = vld [vmem:[%s5339_s6 + $0x78] sm:$0xff]  ;;  %1546 = vmatpush.bf16.msrb.mxu3 %v4002_v44  ;;  %v4042_v44 = vld [vmem:[%s5339_s6 + $0x80] sm:$0xff] }
  0xec   : > { %1277 = vmatmul.bf16.vlgmr.msrb.gmra.mxu2 %v1035_v30  ;;  %1554 = vmatpush.bf16.msra.mxu0 %v4016_v62  ;;  %v4027_v62 = vld [vmem:[%s5339_s6 + $0x8] sm:$0xff] }
  0xed   : > { %v1037_v33 = vpack.c.bf16 %v891_v31, %v890_v18  ;;  %v1006_v34 = vrot.slane %v891_v31, 7  ;;  %v1022_v39 = vrot.slane %v891_v31, 1  ;;  %v4019_v31 = vld [vmem:[%s5338_s5 + $0x88] sm:$0xff] }
  0xee   : > { %1785 = vmatpush.bf16.msra.mxu2 %v4029_v27  ;;  %1573 = vmatpush.bf16.msra.mxu1 %v4019_v31  ;;  %v1334_v31 = vand.u32 7, %v4588_v10 }
  0xef   : > { %1263 = vmatmul.bf16.gmra.mxu1 %v1037_v33  ;;  %v1007_v38 = vsel %vm556_vm0, %v1004_v36, %v1006_v34  ;;  %v1028_v40 = vsel %vm594_vm2, %v1022_v39, 0.0  ;;  %v1023_v43 = vsel %vm594_vm2, %v1020_v21, %v1022_v39  ;;  %v4028_v33 = vld [vmem:[%s5339_s6 + $0x10] sm:$0xff]  ;;  %1795 = vmatpush.bf16.msra.mxu3 %v4041_v28  ;;  %v4034_v28 = vld [vmem:[%s5339_s6 + $0x40] sm:$0xff] }
  0xf0   : > { %v1036_v41 = vpack.c.bf16 %v1007_v38, %v1015_v37  ;;  %v1032_v42 = vmul.f32 %v4680_v0, %v1028_v40  ;;  %v4015_v0 = vld [vmem:[%s5338_s5 + $0x68] sm:$0xff]  ;;  %v4040_v37 = vld [vmem:[%s5339_s6 + $0x70] sm:$0xff]  ;;  %vm1336_vm6 = vcmp.ne.s32.totalorder %v1334_v31, 0  ;;  %vm1845_vm8 = vcmp.ne.s32.totalorder %v1334_v31, 7 }
  0xf1   : > { %1555 = vmatpush.bf16.msra.mxu0 %v4015_v0 }
  0xf2   : > { %1244 = vmatmul.bf16.gmra.mxu0 %v1036_v41  ;;  %v1038_v45 = vpack.c.bf16 %v1032_v42, %v1023_v43  ;;  %v4018_v42 = vld [vmem:[%s5338_s5 + $0x80] sm:$0xff]  ;;  %1786 = vmatpush.bf16.msra.mxu2 %v4028_v33  ;;  %v4974_v33 = vsel %vm1336_vm6, 1.0, %v4387_v35 }
  0xf3   : > { %v977_v59 = vpop.f32.mrf.mxu3  ;;  %1796 = vmatpush.bf16.msra.mxu3 %v4040_v37  ;;  %1574 = vmatpush.bf16.msra.mxu1 %v4018_v42 }
  0xf4   : > { %v988_v7 = vmul.f32 %v4844_v1, %v977_v59  ;;  %v4026_v59 = vld [vmem:[%s5339_s6] sm:$0xff] }
  0xf5   : > { %1556 = vmatpush.bf16.msra.mxu0 %v4014_v49 }
  0xf6   : > { %v993_v23 = vadd.f32 %v4860_v8, %v988_v7  ;;  %1787 = vmatpush.bf16.msra.mxu2 %v4027_v62  ;;  %v4037_v7 = vld [vmem:[%s5339_s6 + $0x58] sm:$0xff] }
  0xf7   : > { %1797 = vmatpush.bf16.msra.mxu3 %v4039_v48  ;;  %v4057_v48 = vld [vmem:[%s5340_s7 + $0x38] sm:$0xff] }
  0xf8   : > { %2048 = vmatpush.bf16.msrb.mxu1 %v4057_v48 }
  0xf9   : > { %1557 = vmatpush.bf16.msra.mxu0 %v4013_v52 }
  0xfa   : > { %1788 = vmatpush.bf16.msra.mxu2 %v4026_v59  ;;  %v4070_v59 = vld [vmem:[%s5340_s7 + $0xa0] sm:$0xff] }
  0xfb   : > { %v979_v22 = vpop.f32.mrf.mxu3  ;;  %1798 = vmatpush.bf16.msra.mxu3 %v4038_v60  ;;  %v4060_v60 = vld [vmem:[%s5340_s7 + $0x50] sm:$0xff] }
  0xfc   : > { %1282 = vmatmul.bf16.gmra.mxu2 %v1038_v45  ;;  %v989_v39 = vmul.f32 %v4844_v1, %v979_v22 }
  0xfd   : > { %1558 = vmatpush.bf16.msra.mxu0 %v4012_v57 }
  0xfe   : > { %v994_v50 = vadd.f32 %v4860_v8, %v989_v39 }
  0xff   : > { %1799 = vmatpush.bf16.msra.mxu3 %v4037_v7  ;;  %v4067_v7 = vld [vmem:[%s5340_s7 + $0x88] sm:$0xff] }
 0x101   : > { %1559 = vmatpush.bf16.msra.mxu0 %v4011_v2 }
 0x103   : > { %v982_v0 = vpop.f32.mrf.mxu3 }
 0x104   : > { %v990_v54 = vmul.f32 %v4844_v1, %v982_v0  ;;  %v4065_v0 = vld [vmem:[%s5340_s7 + $0x78] sm:$0xff] }
 0x105   : > { %1560 = vmatpush.bf16.msra.mxu0 %v4010_v11  ;;  %2062 = vmatpush.bf16.msrb.mxu2 %v4065_v0 }
 0x106   : > { %v995_v63 = vadd.f32 %v4860_v8, %v990_v54  ;;  %v4062_v54 = vld [vmem:[%s5340_s7 + $0x60] sm:$0xff] }
 0x109   : > { %1809 = vmatpush.bf16.msrb.mxu0 %v4049_v17 }
 0x10d   : > { %1810 = vmatpush.bf16.msrb.mxu0 %v4048_v26 }
 0x111   : > { %1811 = vmatpush.bf16.msrb.mxu0 %v4047_v32  ;;  %v1335_v32 = vand.u32 7, %v4606_v16 }
 0x113   : > { %vm1337_vm7 = vcmp.ne.s32.totalorder %v1335_v32, 0  ;;  %vm1846_vm9 = vcmp.ne.s32.totalorder %v1335_v32, 7 }
 0x115   : > { %1812 = vmatpush.bf16.msrb.mxu0 %v4046_v46 }
 0x15c   : > { %v1259_v58 = vpop.f32.mrf.mxu1 }
 0x15f   : > { %v1240_v56 = vpop.f32.mrf.mxu0 }
 0x160   : > { %v1260_v6 = vadd.f32 %v1259_v58, %v1240_v56  ;;  %v4045_v56 = vld [vmem:[%s5339_s6 + $0x98] sm:$0xff] }
 0x161   : > { %1813 = vmatpush.bf16.msrb.mxu0 %v4045_v56  ;;  %v4071_v56 = vld [vmem:[%s5340_s7 + $0xa8] sm:$0xff] }
 0x164   : > { %v1261_v21 = vpop.f32.mrf.mxu1 }
 0x165   : > { %1814 = vmatpush.bf16.msrb.mxu0 %v4044_v4  ;;  %v4068_v4 = vld [vmem:[%s5340_s7 + $0x90] sm:$0xff] }
 0x167   : > { %v1242_v12 = vpop.f32.mrf.mxu0 }
 0x168   : > { %v1262_v29 = vadd.f32 %v1261_v21, %v1242_v12  ;;  %v984_v12 = vpop.f32.mrf.mxu3 }
 0x169   : > { %v991_v21 = vmul.f32 %v4844_v1, %v984_v12  ;;  %1815 = vmatpush.bf16.msrb.mxu0 %v4043_v15  ;;  %v4066_v12 = vld [vmem:[%s5340_s7 + $0x80] sm:$0xff]  ;;  %v4089_v15 = vld [vmem:[#allocation5 + $0x78] sm:$0xff] }
 0x16c   : > { %v1264_v47 = vpop.f32.mrf.mxu1 }
 0x16d   : > { %1816 = vmatpush.bf16.msrb.mxu0 %v4042_v44 }
 0x16f   : > { %v1278_v13 = vpop.f32.mrf.mxu2  ;;  %v1245_v40 = vpop.f32.mrf.mxu0 }
 0x170   : > { %v1279_v18 = vadd.f32 %v1278_v13, %v1260_v6  ;;  %v1265_v52 = vadd.f32 %v1264_v47, %v1245_v40 }
 0x172   : > { %v1289_v24 = vmul.f32 %v4863_v9, %v1279_v18  ;;  %v4036_v18 = vld [vmem:[%s5339_s6 + $0x50] sm:$0xff] }
 0x173   : > { %1800 = vmatpush.bf16.msra.mxu3 %v4036_v18 }
 0x174   : > { %v1294_v36 = vadd.f32 %v4878_v19, %v1289_v24  ;;  %v1266_v11 = vpop.f32.mrf.mxu1 }
 0x176   : > { %v1298_v30 = vadd.f32 %v1294_v36, %v993_v23  ;;  %v996_v36 = vadd.f32 %v4860_v8, %v991_v21 }
 0x177   : > { %v1280_v34 = vpop.f32.mrf.mxu2  ;;  %v1247_v3 = vpop.f32.mrf.mxu0  ;;  %1801 = vmatpush.bf16.msra.mxu3 %v4035_v25 }
 0x178   : > { %v1302_v38 = vmax.f32 %v1298_v30, 0.0  ;;  %v1281_v41 = vadd.f32 %v1280_v34, %v1262_v29  ;;  %v1267_v13 = vadd.f32 %v1266_v11, %v1247_v3  ;;  %v4977_v34 = vsel %vm1337_vm7, 1.0, %v4387_v35  ;;  %v4052_v3 = vld [vmem:[%s5340_s7 + $0x10] sm:$0xff]  ;;  %v4050_v11 = vld [vmem:[%s5340_s7] sm:$0xff] }
 0x17a   : > { %v1306_v43 = vpack.c.bf16 %v1302_v38, %v1302_v38  ;;  %v1290_v45 = vmul.f32 %v4863_v9, %v1281_v41 }
 0x17b   : > { %1802 = vmatpush.bf16.msra.mxu3 %v4034_v28 }
 0x17c   : > { %v1310_v49 = vunpack.c.l.bf16 %v1306_v43  ;;  %v1295_v51 = vadd.f32 %v4878_v19, %v1290_v45 }
 0x17e   : > { %1314 = vst [vmem:[#allocation2] sm:$0xff] %v1310_v49  ;;  %v1299_v53 = vadd.f32 %v1295_v51, %v994_v50  ;;  %v4073_v49 = vld [vmem:[%s5340_s7 + $0xb8] sm:$0xff]  ;;  %v4064_v50 = vld [vmem:[%s5340_s7 + $0x70] sm:$0xff]  ;;  %v4063_v51 = vld [vmem:[%s5340_s7 + $0x68] sm:$0xff] }
 0x17f   : > { %v1283_v55 = vpop.f32.mrf.mxu2  ;;  %2063 = vmatpush.bf16.msrb.mxu2 %v4064_v50  ;;  %v4087_v50 = vld [vmem:[#allocation5 + $0x68] sm:$0xff] }
 0x180   : > { %v1303_v57 = vmax.f32 %v1299_v53, 0.0  ;;  %v1284_v58 = vadd.f32 %v1283_v55, %v1265_v52  ;;  %v4056_v52 = vld [vmem:[%s5340_s7 + $0x30] sm:$0xff]  ;;  %v4055_v55 = vld [vmem:[%s5340_s7 + $0x28] sm:$0xff] }
 0x181   : > { %v4072_v53 = vld [vmem:[%s5340_s7 + $0xb0] sm:$0xff]  ;;  %2049 = vmatpush.bf16.msrb.mxu1 %v4056_v52  ;;  %v4086_v52 = vld [vmem:[#allocation5 + $0x60] sm:$0xff] }
 0x182   : > { %v1307_v61 = vpack.c.bf16 %v1303_v57, %v1303_v57  ;;  %v1291_v2 = vmul.f32 %v4863_v9, %v1284_v58  ;;  %v4061_v57 = vld [vmem:[%s5340_s7 + $0x58] sm:$0xff]  ;;  %v4054_v58 = vld [vmem:[%s5340_s7 + $0x20] sm:$0xff] }
 0x183   : > { %2064 = vmatpush.bf16.msrb.mxu2 %v4063_v51  ;;  %v4080_v51 = vld [vmem:[#allocation5 + $0x30] sm:$0xff] }
 0x184   : > { %v1311_v5 = vunpack.c.l.bf16 %v1307_v61  ;;  %v1296_v6 = vadd.f32 %v4878_v19, %v1291_v2  ;;  %v4053_v61 = vld [vmem:[%s5340_s7 + $0x18] sm:$0xff]  ;;  %v4059_v2 = vld [vmem:[%s5340_s7 + $0x48] sm:$0xff] }
 0x185   : > { %2050 = vmatpush.bf16.msrb.mxu1 %v4055_v55  ;;  %v4096_v55 = vld [vmem:[#allocation5 + $0xb0] sm:$0xff] }
 0x186   : > { %1315 = vst [vmem:[#allocation2 + $0x8] sm:$0xff] %v1311_v5  ;;  %v1300_v14 = vadd.f32 %v1296_v6, %v995_v63  ;;  %v4069_v63 = vld [vmem:[%s5340_s7 + $0x98] sm:$0xff]  ;;  %v4058_v5 = vld [vmem:[%s5340_s7 + $0x40] sm:$0xff]  ;;  %v4051_v6 = vld [vmem:[%s5340_s7 + $0x8] sm:$0xff] }
 0x187   : > { %v1285_v17 = vpop.f32.mrf.mxu2  ;;  %2065 = vmatpush.bf16.msrb.mxu2 %v4062_v54  ;;  %v4097_v54 = vld [vmem:[#allocation5 + $0xb8] sm:$0xff] }
 0x188   : > { %v1304_v20 = vmax.f32 %v1300_v14, 0.0  ;;  %v1286_v22 = vadd.f32 %v1285_v17, %v1267_v13  ;;  %v5058_v14 = vld [vmem:[%s5341_s8] sm:$0x3f] }
 0x189   : > { %2051 = vmatpush.bf16.msrb.mxu1 %v4054_v58  ;;  %v1581_v21 = vperm.slane %v5058_v14, 0  ;;  %v4077_v58 = vld [vmem:[#allocation5 + $0x18] sm:$0xff] }
 0x18a   : > { %v1308_v23 = vpack.c.bf16 %v1304_v20, %v1304_v20  ;;  %v1292_v24 = vmul.f32 %v4863_v9, %v1286_v22  ;;  %v4088_v22 = vld [vmem:[#allocation5 + $0x70] sm:$0xff] }
 0x18b   : > { %2066 = vmatpush.bf16.msrb.mxu2 %v4061_v57  ;;  %v4084_v57 = vld [vmem:[#allocation5 + $0x50] sm:$0xff] }
 0x18c   : > { %v1312_v26 = vunpack.c.l.bf16 %v1308_v23  ;;  %v1297_v27 = vadd.f32 %v4878_v19, %v1292_v24  ;;  %v1584_v24 = vperm.slane %v5058_v14, 1 }
 0x18d   : > { %v1323_v8 = vld [vmem:[#allocation2 + $0x1] ss:$2 sm:$0xff]  ;;  %v1319_v37 = vld [vmem:[#allocation2] ss:$2 sm:$0xff]  ;;  %2052 = vmatpush.bf16.msrb.mxu1 %v4053_v61 }
 0x18e   : > { %1316 = vst [vmem:[#allocation2 + $0x10] sm:$0xff] %v1312_v26  ;;  %v1301_v1 = vadd.f32 %v1297_v27, %v996_v36  ;;  %v1328_v19 = vrot.slane %v1323_v8, 7  ;;  %v4104_v61 = vld [vmem:[#allocation8 + $0x30] sm:$0xff] }
 0x18f   : > { %2067 = vmatpush.bf16.msrb.mxu2 %v4060_v60 }
 0x190   : > { %v1305_v9 = vmax.f32 %v1301_v1, 0.0  ;;  %v1333_v43 = vsel %vm556_vm0, 0.0, %v1328_v19 }
 0x191   : > { %v1342_v46 = vmul.f32 %v4974_v33, %v1333_v43  ;;  %2053 = vmatpush.bf16.msrb.mxu1 %v4052_v3  ;;  %v4094_v3 = vld [vmem:[#allocation5 + $0xa0] sm:$0xff] }
 0x192   : > { %v1309_v29 = vpack.c.bf16 %v1305_v9, %v1305_v9 }
 0x193   : > { %2068 = vmatpush.bf16.msrb.mxu2 %v4059_v2  ;;  %v4076_v2 = vld [vmem:[#allocation5 + $0x10] sm:$0xff] }
 0x194   : > { %v1313_v30 = vunpack.c.l.bf16 %v1309_v29 }
 0x195   : > { %2054 = vmatpush.bf16.msrb.mxu1 %v4051_v6  ;;  %v4082_v6 = vld [vmem:[#allocation5 + $0x40] sm:$0xff] }
 0x196   : > { %1317 = vst [vmem:[#allocation2 + $0x18] sm:$0xff] %v1313_v30 }
 0x197   : > { %2069 = vmatpush.bf16.msrb.mxu2 %v4058_v5 }
 0x199   : > { %2055 = vmatpush.bf16.msrb.mxu1 %v4050_v11  ;;  %v4093_v11 = vld [vmem:[#allocation5 + $0x98] sm:$0xff] }
 0x19d   : > { %v1321_v38 = vld [vmem:[#allocation2 + $0x10] ss:$2 sm:$0xff]  ;;  %v1325_v39 = vld [vmem:[#allocation2 + $0x11] ss:$2 sm:$0xff] }
 0x19e   : > { %v1345_v41 = vpack.c.bf16 %v1321_v38, %v1319_v37  ;;  %v1329_v40 = vrot.slane %v1325_v39, 7  ;;  %v1346_v42 = vpack.c.bf16 %v1325_v39, %v1323_v8  ;;  %v3551_v38 = vsel %vm1845_vm8, 1.0, %v4387_v35 }
 0x19f   : > { %v3552_v39 = vsel %vm1846_vm9, 1.0, %v4387_v35 }
 0x1a0   : > { %1561 = vmatmul.bf16.vlgmr.msra.gmra.mxu0 %v1345_v41  ;;  %1575 = vmatmul.bf16.vlgmr.msra.gmra.mxu1 %v1346_v42  ;;  %v1330_v45 = vsel %vm556_vm0, %v1328_v19, %v1329_v40 }
 0x1a1   : > { %v1343_v62 = vmul.f32 %v4977_v34, %v1330_v45  ;;  %2327 = vmatpush.bf16.msra.mxu1 %v4089_v15 }
 0x1a3   : > { %v1344_v47 = vpack.c.bf16 %v1343_v62, %v1342_v46 }
 0x1a5   : > { %1547 = vmatmul.bf16.vlgmr.msrb.gmra.mxu3 %v1344_v47  ;;  %1789 = vmatmul.bf16.vlgmr.msra.gmra.mxu2 %v1344_v47 }
 0x1a6   : > { %2076 = vmatpush.bf16.msrb.mxu3 %v4073_v49  ;;  %2328 = vmatpush.bf16.msra.mxu1 %v4088_v22  ;;  %v4081_v49 = vld [vmem:[#allocation5 + $0x38] sm:$0xff] }
 0x1a7   : > { %2314 = vmatpush.bf16.msra.mxu0 %v4081_v49  ;;  %2340 = vmatpush.bf16.msra.mxu2 %v4097_v54  ;;  %v4113_v22 = vld [vmem:[#allocation8 + $0x78] sm:$0xff]  ;;  %v4116_v49 = vld [vmem:[#allocation8 + $0x90] sm:$0xff] }
 0x1aa   : > { %2077 = vmatpush.bf16.msrb.mxu3 %v4072_v53  ;;  %2329 = vmatpush.bf16.msra.mxu1 %v4087_v50  ;;  %v4079_v53 = vld [vmem:[#allocation5 + $0x28] sm:$0xff] }
 0x1ab   : > { %2315 = vmatpush.bf16.msra.mxu0 %v4080_v51  ;;  %2341 = vmatpush.bf16.msra.mxu2 %v4096_v55 }
 0x1ae   : > { %2078 = vmatpush.bf16.msrb.mxu3 %v4071_v56  ;;  %2330 = vmatpush.bf16.msra.mxu1 %v4086_v52  ;;  %v4105_v56 = vld [vmem:[#allocation8 + $0x38] sm:$0xff] }
 0x1af   : > { %2316 = vmatpush.bf16.msra.mxu0 %v4079_v53  ;;  %v4109_v53 = vld [vmem:[#allocation8 + $0x58] sm:$0xff] }
 0x1b0   : > { %1817 = vmatmul.bf16.vlgmr.msrb.gmra.mxu0 %v1346_v42 }
 0x1b2   : > { %2079 = vmatpush.bf16.msrb.mxu3 %v4070_v59  ;;  %v4095_v59 = vld [vmem:[#allocation5 + $0xa8] sm:$0xff] }
 0x1b3   : > { %2342 = vmatpush.bf16.msra.mxu2 %v4095_v59 }
 0x1b5   : > { %1803 = vmatmul.bf16.vlgmr.msra.gmra.mxu3 %v1345_v41 }
 0x1b6   : > { %2080 = vmatpush.bf16.msrb.mxu3 %v4069_v63  ;;  %v4083_v63 = vld [vmem:[#allocation5 + $0x48] sm:$0xff] }
 0x1b7   : > { %2343 = vmatpush.bf16.msra.mxu2 %v4094_v3 }
 0x1ba   : > { %2081 = vmatpush.bf16.msrb.mxu3 %v4068_v4  ;;  %v4103_v4 = vld [vmem:[#allocation8 + $0x28] sm:$0xff] }
 0x1bb   : > { %2344 = vmatpush.bf16.msra.mxu2 %v4093_v11 }
 0x1be   : > { %2082 = vmatpush.bf16.msrb.mxu3 %v4067_v7  ;;  %v4075_v7 = vld [vmem:[#allocation5 + $0x8] sm:$0xff] }
 0x1c2   : > { %2083 = vmatpush.bf16.msrb.mxu3 %v4066_v12  ;;  %v4121_v12 = vld [vmem:[#allocation8 + $0xb8] sm:$0xff] }
 0x1c6   : > { %2550 = vmatpush.bf16.msra.mxu3 %v4105_v56 }
 0x1ca   : > { %2551 = vmatpush.bf16.msra.mxu3 %v4104_v61  ;;  %v4114_v61 = vld [vmem:[#allocation8 + $0x80] sm:$0xff] }
 0x1ce   : > { %2552 = vmatpush.bf16.msra.mxu3 %v4103_v4 }
 0x21d   : > { %v1562_v13 = vpop.f32.mrf.mxu0  ;;  %v1576_v17 = vpop.f32.mrf.mxu1 }
 0x225   : > { %v1564_v26 = vpop.f32.mrf.mxu0  ;;  %v1578_v1 = vpop.f32.mrf.mxu1 }
 0x228   : > { %v1548_v18 = vpop.f32.mrf.mxu3  ;;  %v1790_v60 = vpop.f32.mrf.mxu2 }
 0x229   : > { %v1563_v20 = vadd.f32 %v1562_v13, %v1548_v18  ;;  %v4102_v13 = vld [vmem:[#allocation8 + $0x20] sm:$0xff]  ;;  %v4092_v18 = vld [vmem:[#allocation5 + $0x90] sm:$0xff] }
 0x22a   : > { %2553 = vmatpush.bf16.msra.mxu3 %v4102_v13  ;;  %2345 = vmatpush.bf16.msra.mxu2 %v4092_v18  ;;  %v4137_v13 = vld [vmem:[#allocation10 + $0x78] sm:$0xff]  ;;  %v4136_v18 = vld [vmem:[#allocation10 + $0x70] sm:$0xff] }
 0x22b   : > { %v1577_v23 = vadd.f32 %v1576_v17, %v1563_v20  ;;  %v4074_v17 = vld [vmem:[#allocation5] sm:$0xff]  ;;  %v4120_v20 = vld [vmem:[#allocation8 + $0xb0] sm:$0xff] }
 0x22d   : > { %v1582_v44 = vmul.f32 %v1581_v21, %v1577_v23  ;;  %v4091_v23 = vld [vmem:[#allocation5 + $0x88] sm:$0xff] }
 0x22e   : > { %2346 = vmatpush.bf16.msra.mxu2 %v4091_v23 }
 0x22f   : > { %v1585_v25 = vadd.f32 %v1584_v24, %v1582_v44  ;;  %v4100_v44 = vld [vmem:[#allocation8 + $0x10] sm:$0xff] }
 0x230   : > { %v1550_v36 = vpop.f32.mrf.mxu3  ;;  %v1792_v15 = vpop.f32.mrf.mxu2 }
 0x231   : > { %v1565_v27 = vadd.f32 %v1564_v26, %v1550_v36  ;;  %v1587_v9 = vmax.f32 %v1585_v25, 0.0  ;;  %v4112_v26 = vld [vmem:[#allocation8 + $0x70] sm:$0xff]  ;;  %v1818_v36 = vpop.f32.mrf.mxu0 }
 0x233   : > { %v1579_v28 = vadd.f32 %v1578_v1, %v1565_v27  ;;  %v1831_v30 = vrot.slane %v1587_v9, 7  ;;  %v1839_v37 = vrot.slane %v1587_v9, 1 }
 0x235   : > { %v1583_v29 = vmul.f32 %v1581_v21, %v1579_v28  ;;  %v1836_v43 = vsel %vm556_vm0, 0.0, %v1831_v30  ;;  %v4101_v21 = vld [vmem:[#allocation8 + $0x18] sm:$0xff] }
 0x236   : > { %v1837_v16 = vmul.f32 %v4974_v33, %v1836_v43  ;;  %v4085_v33 = vld [vmem:[#allocation5 + $0x58] sm:$0xff]  ;;  %2554 = vmatpush.bf16.msra.mxu3 %v4101_v21  ;;  %v4135_v21 = vld [vmem:[#allocation10 + $0x68] sm:$0xff] }
 0x237   : > { %v1586_v8 = vadd.f32 %v1584_v24, %v1583_v29  ;;  %2331 = vmatpush.bf16.msra.mxu1 %v4085_v33  ;;  %v4119_v24 = vld [vmem:[#allocation8 + $0xa8] sm:$0xff]  ;;  %v4118_v29 = vld [vmem:[#allocation8 + $0xa0] sm:$0xff] }
 0x238   : > { %v1804_v5 = vpop.f32.mrf.mxu3 }
 0x239   : > { %v1588_v19 = vmax.f32 %v1586_v8, 0.0  ;;  %v1805_v27 = vadd.f32 %v1804_v5, %v1790_v60  ;;  %v4111_v8 = vld [vmem:[#allocation8 + $0x68] sm:$0xff] }
 0x23a   : > { %2555 = vmatpush.bf16.msra.mxu3 %v4100_v44 }
 0x23b   : > { %v1832_v41 = vrot.slane %v1588_v19, 7  ;;  %v1840_v40 = vrot.slane %v1588_v19, 1  ;;  %v1854_v42 = vpack.c.bf16 %v1588_v19, %v1587_v9  ;;  %2332 = vmatpush.bf16.msra.mxu1 %v4084_v57  ;;  %v4090_v9 = vld [vmem:[#allocation5 + $0x80] sm:$0xff]  ;;  %v1819_v19 = vadd.f32 %v1818_v36, %v1805_v27 }
 0x23c   : > { %2347 = vmatpush.bf16.msra.mxu2 %v4090_v9  ;;  %v4134_v36 = vld [vmem:[#allocation10 + $0x60] sm:$0xff]  ;;  %v4145_v9 = vld [vmem:[#allocation10 + $0xb8] sm:$0xff] }
 0x23d   : > { %2070 = vmatmul.bf16.vlgmr.msrb.gmra.mxu2 %v1854_v42  ;;  %v1833_v45 = vsel %vm556_vm0, %v1831_v30, %v1832_v41  ;;  %v1841_v46 = vsel %vm594_vm2, %v1839_v37, %v1840_v40  ;;  %v1844_v31 = vsel %vm594_vm2, %v1840_v40, 0.0  ;;  %v4099_v30 = vld [vmem:[#allocation8 + $0x8] sm:$0xff]  ;;  %v1823_v37 = vperm.slane %v5058_v14, 2  ;;  %v4117_v42 = vld [vmem:[#allocation8 + $0x98] sm:$0xff] }
 0x23e   : > { %v1838_v32 = vmul.f32 %v4977_v34, %v1833_v45  ;;  %v1851_v62 = vmul.f32 %v3551_v38, %v1841_v46  ;;  %v1852_v47 = vmul.f32 %v3552_v39, %v1844_v31  ;;  %v4078_v34 = vld [vmem:[#allocation5 + $0x20] sm:$0xff]  ;;  %v2090_v39 = vperm.slane %v5058_v14, 4  ;;  %2556 = vmatpush.bf16.msra.mxu3 %v4099_v30  ;;  %v4127_v30 = vld [vmem:[#allocation10 + $0x28] sm:$0xff] }
 0x23f   : > { %2317 = vmatpush.bf16.msra.mxu0 %v4078_v34  ;;  %2333 = vmatpush.bf16.msra.mxu1 %v4083_v63  ;;  %v1826_v41 = vperm.slane %v5058_v14, 3  ;;  %v1824_v43 = vmul.f32 %v1823_v37, %v1819_v19  ;;  %v2093_v31 = vperm.slane %v5058_v14, 5  ;;  %v4115_v34 = vld [vmem:[#allocation8 + $0x88] sm:$0xff]  ;;  %v4108_v14 = vld [vmem:[#allocation8 + $0x50] sm:$0xff]  ;;  %v4133_v19 = vld [vmem:[#allocation10 + $0x58] sm:$0xff] }
 0x240   : > { %v1853_v0 = vpack.c.bf16 %v1838_v32, %v1837_v16  ;;  %v1855_v48 = vpack.c.bf16 %v1852_v47, %v1851_v62  ;;  %v1806_v25 = vpop.f32.mrf.mxu3  ;;  %v4098_v16 = vld [vmem:[#allocation8] sm:$0xff]  ;;  %v1820_v62 = vpop.f32.mrf.mxu0  ;;  %v4107_v63 = vld [vmem:[#allocation8 + $0x48] sm:$0xff] }
 0x241   : > { %v1807_v45 = vadd.f32 %v1806_v25, %v1792_v15  ;;  %v4110_v32 = vld [vmem:[#allocation8 + $0x60] sm:$0xff]  ;;  %v1827_v50 = vadd.f32 %v1826_v41, %v1824_v43  ;;  %v4129_v15 = vld [vmem:[#allocation10 + $0x38] sm:$0xff]  ;;  %v4124_v43 = vld [vmem:[#allocation10 + $0x10] sm:$0xff] }
 0x242   : > { %2056 = vmatmul.bf16.vlgmr.msrb.gmra.mxu1 %v1853_v0  ;;  %2084 = vmatmul.bf16.vlgmr.msrb.gmra.mxu3 %v1855_v48 }
 0x243   : > { %2318 = vmatpush.bf16.msra.mxu0 %v4077_v58  ;;  %2334 = vmatpush.bf16.msra.mxu1 %v4082_v6  ;;  %v1821_v51 = vadd.f32 %v1820_v62, %v1807_v45  ;;  %v4140_v45 = vld [vmem:[#allocation10 + $0x90] sm:$0xff]  ;;  %v4138_v62 = vld [vmem:[#allocation10 + $0x80] sm:$0xff] }
 0x244   : > { %2557 = vmatpush.bf16.msra.mxu3 %v4098_v16  ;;  %2800 = vmatpush.bf16.msrb.mxu2 %v4129_v15  ;;  %v4139_v16 = vld [vmem:[#allocation10 + $0x88] sm:$0xff] }
 0x245   : > { %v1825_v56 = vmul.f32 %v1823_v37, %v1821_v51  ;;  %v4126_v37 = vld [vmem:[#allocation10 + $0x20] sm:$0xff]  ;;  %v2883_v51 = vld [vmem:[%s5346_s13 + $0xf0] sm:$0xff] }
 0x247   : > { %2319 = vmatpush.bf16.msra.mxu0 %v4076_v2  ;;  %2576 = vmatpush.bf16.msrb.mxu1 %v4121_v12  ;;  %v1828_v2 = vadd.f32 %v1826_v41, %v1825_v56  ;;  %v4125_v41 = vld [vmem:[#allocation10 + $0x18] sm:$0xff] }
 0x248   : > { %2813 = vmatpush.bf16.msrb.mxu3 %v4137_v13 }
 0x24b   : > { %2320 = vmatpush.bf16.msra.mxu0 %v4075_v7  ;;  %2577 = vmatpush.bf16.msrb.mxu1 %v4120_v20  ;;  %v4106_v7 = vld [vmem:[#allocation8 + $0x40] sm:$0xff]  ;;  %v4128_v20 = vld [vmem:[#allocation10 + $0x30] sm:$0xff] }
 0x24c   : > { %2814 = vmatpush.bf16.msrb.mxu3 %v4136_v18  ;;  %2801 = vmatpush.bf16.msrb.mxu2 %v4128_v20 }
 0x24f   : > { %2321 = vmatpush.bf16.msra.mxu0 %v4074_v17  ;;  %2578 = vmatpush.bf16.msrb.mxu1 %v4119_v24  ;;  %v2114_v17 = vand.u32 3, %v4588_v10 }
 0x250   : > { %2815 = vmatpush.bf16.msrb.mxu3 %v4135_v21  ;;  %2802 = vmatpush.bf16.msrb.mxu2 %v4127_v30  ;;  %v2864_v30 = vld [vmem:[%s5346_s13 + $0x58] sm:$0xff] }
 0x251   : > { %vm2115_vm10 = vcmp.ne.s32.totalorder %v2114_v17, 0  ;;  %vm2601_vm11 = vcmp.ne.s32.totalorder %v2114_v17, 3 }
 0x253   : > { %2563 = vmatpush.bf16.msrb.mxu0 %v4113_v22  ;;  %2579 = vmatpush.bf16.msrb.mxu1 %v4118_v29  ;;  %v4144_v29 = vld [vmem:[#allocation10 + $0xb0] sm:$0xff] }
 0x254   : > { %2816 = vmatpush.bf16.msrb.mxu3 %v4134_v36  ;;  %2803 = vmatpush.bf16.msrb.mxu2 %v4126_v37  ;;  %v2882_v36 = vld [vmem:[%s5346_s13 + $0xe8] sm:$0xff]  ;;  %v2912_v37 = vld [vmem:[%s5346_s13 + $0x1d8] sm:$0xff] }
 0x257   : > { %2564 = vmatpush.bf16.msrb.mxu0 %v4112_v26  ;;  %2580 = vmatpush.bf16.msrb.mxu1 %v4117_v42  ;;  %v5082_v26 = vsel %vm2115_vm10, 1.0, %v4387_v35  ;;  %v4131_v42 = vld [vmem:[#allocation10 + $0x48] sm:$0xff] }
 0x258   : > { %2817 = vmatpush.bf16.msrb.mxu3 %v4133_v19  ;;  %2804 = vmatpush.bf16.msrb.mxu2 %v4125_v41  ;;  %v2896_v19 = vld [vmem:[%s5346_s13 + $0x158] sm:$0xff]  ;;  %v2895_v41 = vld [vmem:[%s5346_s13 + $0x150] sm:$0xff] }
 0x25b   : > { %2565 = vmatpush.bf16.msrb.mxu0 %v4111_v8  ;;  %2581 = vmatpush.bf16.msrb.mxu1 %v4116_v49  ;;  %v4143_v8 = vld [vmem:[#allocation10 + $0xa8] sm:$0xff]  ;;  %v2916_v49 = vld [vmem:[%s5346_s13 + $0x1f8] sm:$0xff] }
 0x25c   : > { %2805 = vmatpush.bf16.msrb.mxu2 %v4124_v43  ;;  %v2878_v43 = vld [vmem:[%s5346_s13 + $0xc8] sm:$0xff] }
 0x25f   : > { %2566 = vmatpush.bf16.msrb.mxu0 %v4110_v32  ;;  %2582 = vmatpush.bf16.msrb.mxu1 %v4115_v34  ;;  %v4122_v32 = vld [vmem:[#allocation10] sm:$0xff] }
 0x263   : > { %2567 = vmatpush.bf16.msrb.mxu0 %v4109_v53  ;;  %2583 = vmatpush.bf16.msrb.mxu1 %v4114_v61  ;;  %v2915_v53 = vld [vmem:[%s5346_s13 + $0x1f0] sm:$0xff] }
 0x267   : > { %2568 = vmatpush.bf16.msrb.mxu0 %v4108_v14 }
 0x26b   : > { %2569 = vmatpush.bf16.msrb.mxu0 %v4107_v63 }
 0x26f   : > { %2570 = vmatpush.bf16.msrb.mxu0 %v4106_v7 }
 0x2bf   : > { %v2057_v1 = vpop.f32.mrf.mxu1 }
 0x2c0   : > { %v2071_v28 = vpop.f32.mrf.mxu2 }
 0x2c1   : > { %v2072_v38 = vadd.f32 %v2071_v28, %v2057_v1 }
 0x2c5   : > { %v2085_v40 = vpop.f32.mrf.mxu3 }
 0x2c6   : > { %v2086_v46 = vadd.f32 %v2085_v40, %v2072_v38  ;;  %v4142_v38 = vld [vmem:[#allocation10 + $0xa0] sm:$0xff]  ;;  %v4141_v40 = vld [vmem:[#allocation10 + $0x98] sm:$0xff] }
 0x2c7   : > { %v2059_v0 = vpop.f32.mrf.mxu1 }
 0x2c8   : > { %v2091_v47 = vmul.f32 %v2090_v39, %v2086_v46  ;;  %v2073_v48 = vpop.f32.mrf.mxu2  ;;  %v4130_v46 = vld [vmem:[#allocation10 + $0x40] sm:$0xff] }
 0x2c9   : > { %v2074_v33 = vadd.f32 %v2073_v48, %v2059_v0  ;;  %v2884_v0 = vld [vmem:[%s5346_s13 + $0xf8] sm:$0xff] }
 0x2ca   : > { %v2094_v52 = vadd.f32 %v2093_v31, %v2091_v47  ;;  %v2868_v47 = vld [vmem:[%s5346_s13 + $0x78] sm:$0xff] }
 0x2cb   : > { %v2900_v48 = vld [vmem:[%s5346_s13 + $0x178] sm:$0xff] }
 0x2cc   : > { %v2096_v54 = vadd.f32 %v2094_v52, %v1827_v50  ;;  %v2867_v50 = vld [vmem:[%s5346_s13 + $0x70] sm:$0xff] }
 0x2cd   : > { %v2087_v55 = vpop.f32.mrf.mxu3  ;;  %v2899_v52 = vld [vmem:[%s5346_s13 + $0x170] sm:$0xff] }
 0x2ce   : > { %v2098_v57 = vmax.f32 %v2096_v54, 0.0  ;;  %v2088_v58 = vadd.f32 %v2087_v55, %v2074_v33  ;;  %v5113_v33 = vld [vmem:[%s5345_s12] sm:$0x3f] }
 0x2cf   : > { %v2353_v56 = vperm.slane %v5113_v33, 0 }
 0x2d0   : > { %v2100_v59 = vpack.c.bf16 %v2098_v57, %v2098_v57  ;;  %v2092_v60 = vmul.f32 %v2090_v39, %v2088_v58  ;;  %v4132_v39 = vld [vmem:[#allocation10 + $0x50] sm:$0xff]  ;;  %v2355_v58 = vperm.slane %v5113_v33, 1 }
 0x2d1   : > { %2818 = vmatpush.bf16.msrb.mxu3 %v4132_v39  ;;  %v2879_v39 = vld [vmem:[%s5346_s13 + $0xd0] sm:$0xff] }
 0x2d2   : > { %v2102_v3 = vunpack.c.l.bf16 %v2100_v59  ;;  %v2095_v4 = vadd.f32 %v2093_v31, %v2092_v60  ;;  %v4123_v31 = vld [vmem:[#allocation10 + $0x8] sm:$0xff] }
 0x2d3   : > { %2806 = vmatpush.bf16.msrb.mxu2 %v4123_v31  ;;  %v2861_v31 = vld [vmem:[%s5346_s13 + $0x40] sm:$0xff] }
 0x2d4   : > { %2104 = vst [vmem:[#allocation3] sm:$0xff] %v2102_v3  ;;  %v2097_v5 = vadd.f32 %v2095_v4, %v1828_v2 }
 0x2d5   : > { %2819 = vmatpush.bf16.msrb.mxu3 %v4131_v42  ;;  %v2862_v42 = vld [vmem:[%s5346_s13 + $0x48] sm:$0xff] }
 0x2d6   : > { %v2099_v6 = vmax.f32 %v2097_v5, 0.0 }
 0x2d7   : > { %2807 = vmatpush.bf16.msrb.mxu2 %v4122_v32  ;;  %v2893_v32 = vld [vmem:[%s5346_s13 + $0x140] sm:$0xff] }
 0x2d8   : > { %v2101_v11 = vpack.c.bf16 %v2099_v6, %v2099_v6 }
 0x2d9   : > { %2820 = vmatpush.bf16.msrb.mxu3 %v4130_v46  ;;  %v2910_v46 = vld [vmem:[%s5346_s13 + $0x1c8] sm:$0xff] }
 0x2da   : > { %v2103_v12 = vunpack.c.l.bf16 %v2101_v11 }
 0x2dc   : > { %2105 = vst [vmem:[#allocation3 + $0x8] sm:$0xff] %v2103_v12  ;;  %v3842_v12 = vsel %vm2601_vm11, 1.0, %v4387_v35  ;;  %v2866_v35 = vld [vmem:[%s5346_s13 + $0x68] sm:$0xff] }
 0x2e3   : > { %v2107_v22 = vld [vmem:[#allocation3] ss:$2 sm:$0xff]  ;;  %v2109_v23 = vld [vmem:[#allocation3 + $0x1] ss:$2 sm:$0xff] }
 0x2e4   : > { %v2120_v24 = vpack.c.bf16 %v2107_v22, %v2107_v22  ;;  %v2111_v44 = vrot.slane %v2109_v23, 7  ;;  %v2121_v25 = vpack.c.bf16 %v2109_v23, %v2109_v23 }
 0x2e6   : > { %2335 = vmatmul.bf16.vlgmr.msra.gmra.mxu1 %v2120_v24  ;;  %2348 = vmatmul.bf16.vlgmr.msra.gmra.mxu2 %v2121_v25  ;;  %v2113_v27 = vsel %vm556_vm0, 0.0, %v2111_v44 }
 0x2e7   : > { %v2118_v1 = vmul.f32 %v5082_v26, %v2113_v27  ;;  %2921 = vmatpush.msra.mxu1 %v2868_v47  ;;  %2941 = vmatpush.msra.mxu2 %v2884_v0  ;;  %v2914_v27 = vld [vmem:[%s5346_s13 + $0x1e8] sm:$0xff]  ;;  %v2860_v47 = vld [vmem:[%s5346_s13 + $0x38] sm:$0xff] }
 0x2e8   : > { %v2876_v0 = vld [vmem:[%s5346_s13 + $0xb8] sm:$0xff] }
 0x2e9   : > { %v2119_v28 = vpack.c.bf16 %v2118_v1, %v2118_v1  ;;  %2922 = vmatpush.msra.mxu1 %v2867_v50  ;;  %2942 = vmatpush.msra.mxu2 %v2883_v51  ;;  %v2865_v1 = vld [vmem:[%s5346_s13 + $0x60] sm:$0xff]  ;;  %v2859_v50 = vld [vmem:[%s5346_s13 + $0x30] sm:$0xff] }
 0x2ea   : > { %v2875_v51 = vld [vmem:[%s5346_s13 + $0xb0] sm:$0xff] }
 0x2eb   : > { %2322 = vmatmul.bf16.vlgmr.msra.gmra.mxu0 %v2119_v28  ;;  %2558 = vmatmul.bf16.vlgmr.msra.gmra.mxu3 %v2119_v28  ;;  %v2897_v28 = vld [vmem:[%s5346_s13 + $0x160] sm:$0xff] }
 0x2ec   : > { %2826 = vmatpush.bf16.msra.mxu0 %v4145_v9  ;;  %2961 = vmatpush.msra.mxu3 %v2900_v48  ;;  %v2881_v9 = vld [vmem:[%s5346_s13 + $0xe0] sm:$0xff]  ;;  %v2892_v48 = vld [vmem:[%s5346_s13 + $0x138] sm:$0xff] }
 0x2ed   : > { %2923 = vmatpush.msra.mxu1 %v2866_v35  ;;  %2943 = vmatpush.msra.mxu2 %v2882_v36 }
 0x2ee   : > { %2962 = vmatpush.msra.mxu3 %v2899_v52  ;;  %v2891_v52 = vld [vmem:[%s5346_s13 + $0x130] sm:$0xff] }
 0x2ef   : > { %2924 = vmatpush.msra.mxu1 %v2865_v1  ;;  %2944 = vmatpush.msra.mxu2 %v2881_v9  ;;  %v2841_v1 = vperm.slane %v5113_v33, 5 }
 0x2f0   : > { %2827 = vmatpush.bf16.msra.mxu0 %v4144_v29  ;;  %v2913_v29 = vld [vmem:[%s5346_s13 + $0x1e0] sm:$0xff] }
 0x2f1   : > { %2925 = vmatpush.msra.mxu1 %v2864_v30 }
 0x2f4   : > { %2828 = vmatpush.bf16.msra.mxu0 %v4143_v8  ;;  %v2880_v8 = vld [vmem:[%s5346_s13 + $0xd8] sm:$0xff] }
 0x2f5   : > { %2945 = vmatpush.msra.mxu2 %v2880_v8 }
 0x2f6   : > { %2584 = vmatmul.bf16.vlgmr.msrb.gmra.mxu1 %v2121_v25 }
 0x2f7   : > { %2946 = vmatpush.msra.mxu2 %v2879_v39 }
 0x2f8   : > { %2829 = vmatpush.bf16.msra.mxu0 %v4142_v38  ;;  %v2863_v38 = vld [vmem:[%s5346_s13 + $0x50] sm:$0xff] }
 0x2f9   : > { %2926 = vmatpush.msra.mxu1 %v2863_v38  ;;  %2947 = vmatpush.msra.mxu2 %v2878_v43 }
 0x2fb   : > { %2571 = vmatmul.bf16.vlgmr.msrb.gmra.mxu0 %v2120_v24  ;;  %2927 = vmatpush.msra.mxu1 %v2862_v42 }
 0x2fc   : > { %2830 = vmatpush.bf16.msra.mxu0 %v4141_v40  ;;  %v2911_v40 = vld [vmem:[%s5346_s13 + $0x1d0] sm:$0xff] }
 0x2fd   : > { %2928 = vmatpush.msra.mxu1 %v2861_v31 }
 0x2ff   : > { %2929 = vmatpush.msra.mxu1 %v2860_v47 }
 0x300   : > { %2831 = vmatpush.bf16.msra.mxu0 %v4140_v45  ;;  %v2894_v45 = vld [vmem:[%s5346_s13 + $0x148] sm:$0xff] }
 0x301   : > { %2930 = vmatpush.msra.mxu1 %v2859_v50 }
 0x304   : > { %2832 = vmatpush.bf16.msra.mxu0 %v4139_v16  ;;  %v2877_v16 = vld [vmem:[%s5346_s13 + $0xc0] sm:$0xff] }
 0x305   : > { %2948 = vmatpush.msra.mxu2 %v2877_v16 }
 0x307   : > { %2949 = vmatpush.msra.mxu2 %v2876_v0 }
 0x308   : > { %2833 = vmatpush.bf16.msra.mxu0 %v4138_v62  ;;  %v2909_v62 = vld [vmem:[%s5346_s13 + $0x1c0] sm:$0xff] }
 0x309   : > { %2950 = vmatpush.msra.mxu2 %v2875_v51 }
 0x30c   : > { %2981 = vmatpush.msrb.mxu0 %v2916_v49  ;;  %v2908_v49 = vld [vmem:[%s5346_s13 + $0x1b8] sm:$0xff] }
 0x30e   : > { %2982 = vmatpush.msrb.mxu0 %v2915_v53  ;;  %v2907_v53 = vld [vmem:[%s5346_s13 + $0x1b0] sm:$0xff] }
 0x310   : > { %2983 = vmatpush.msrb.mxu0 %v2914_v27 }
 0x312   : > { %2984 = vmatpush.msrb.mxu0 %v2913_v29 }
 0x314   : > { %2985 = vmatpush.msrb.mxu0 %v2912_v37 }
 0x316   : > { %2986 = vmatpush.msrb.mxu0 %v2911_v40 }
 0x318   : > { %2987 = vmatpush.msrb.mxu0 %v2910_v46 }
 0x31a   : > { %2988 = vmatpush.msrb.mxu0 %v2909_v62 }
 0x31c   : > { %2989 = vmatpush.msrb.mxu0 %v2908_v49 }
 0x31e   : > { %2990 = vmatpush.msrb.mxu0 %v2907_v53 }
 0x363   : > { %v2336_v54 = vpop.f32.mrf.mxu1 }
 0x368   : > { %v2323_v34 = vpop.f32.mrf.mxu0 }
 0x369   : > { %v2337_v55 = vadd.f32 %v2336_v54, %v2323_v34  ;;  %v2349_v14 = vpop.f32.mrf.mxu2  ;;  %v2858_v54 = vld [vmem:[%s5346_s13 + $0x28] sm:$0xff] }
 0x36a   : > { %v2874_v34 = vld [vmem:[%s5346_s13 + $0xa8] sm:$0xff]  ;;  %2931 = vmatpush.msra.mxu1 %v2858_v54 }
 0x36b   : > { %v2350_v57 = vadd.f32 %v2349_v14, %v2337_v55  ;;  %v2338_v59 = vpop.f32.mrf.mxu1  ;;  %v2890_v55 = vld [vmem:[%s5346_s13 + $0x128] sm:$0xff]  ;;  %2951 = vmatpush.msra.mxu2 %v2874_v34 }
 0x36c   : > { %v2906_v14 = vld [vmem:[%s5346_s13 + $0x1a8] sm:$0xff]  ;;  %v2905_v59 = vld [vmem:[%s5346_s13 + $0x1a0] sm:$0xff] }
 0x36d   : > { %v2354_v60 = vmul.f32 %v2353_v56, %v2350_v57  ;;  %2991 = vmatpush.msrb.mxu0 %v2906_v14  ;;  %v2857_v56 = vld [vmem:[%s5346_s13 + $0x20] sm:$0xff] }
 0x36e   : > { %v2559_v61 = vpop.f32.mrf.mxu3  ;;  %v2873_v57 = vld [vmem:[%s5346_s13 + $0xa0] sm:$0xff]  ;;  %2932 = vmatpush.msra.mxu1 %v2857_v56 }
 0x36f   : > { %v2356_v63 = vadd.f32 %v2355_v58, %v2354_v60  ;;  %v2889_v58 = vld [vmem:[%s5346_s13 + $0x120] sm:$0xff]  ;;  %2952 = vmatpush.msra.mxu2 %v2873_v57  ;;  %2992 = vmatpush.msrb.mxu0 %v2905_v59  ;;  %v2856_v60 = vld [vmem:[%s5346_s13 + $0x18] sm:$0xff] }
 0x370   : > { %v2325_v2 = vpop.f32.mrf.mxu0  ;;  %2933 = vmatpush.msra.mxu1 %v2856_v60 }
 0x371   : > { %v2357_v3 = vmax.f32 %v2356_v63, 0.0  ;;  %v2351_v4 = vpop.f32.mrf.mxu2  ;;  %v2888_v63 = vld [vmem:[%s5346_s13 + $0x118] sm:$0xff] }
 0x372   : > { %v2904_v2 = vld [vmem:[%s5346_s13 + $0x198] sm:$0xff]  ;;  %v2871_v4 = vld [vmem:[%s5346_s13 + $0x90] sm:$0xff] }
 0x373   : > { %v2594_v5 = vrot.slane %v2357_v3, 7  ;;  %v2598_v6 = vrot.slane %v2357_v3, 1  ;;  %v2585_v7 = vpop.f32.mrf.mxu1  ;;  %v2606_v11 = vpack.c.bf16 %v2357_v3, %v2357_v3  ;;  %v2855_v3 = vld [vmem:[%s5346_s13 + $0x10] sm:$0xff]  ;;  %2993 = vmatpush.msrb.mxu0 %v2904_v2 }
 0x374   : > { %2934 = vmatpush.msra.mxu1 %v2855_v3 }
 0x375   : > { %2821 = vmatmul.bf16.vlgmr.msrb.gmra.mxu3 %v2606_v11  ;;  %v2596_v13 = vsel %vm556_vm0, 0.0, %v2594_v5  ;;  %v2600_v15 = vsel %vm594_vm2, %v2598_v6, 0.0  ;;  %v2887_v5 = vld [vmem:[%s5346_s13 + $0x110] sm:$0xff]  ;;  %v2870_v11 = vld [vmem:[%s5346_s13 + $0x88] sm:$0xff] }
 0x376   : > { %v2561_v18 = vpop.f32.mrf.mxu3  ;;  %v2597_v20 = vmul.f32 %v5082_v26, %v2596_v13  ;;  %v2604_v21 = vmul.f32 %v3842_v12, %v2600_v15  ;;  %v2898_v26 = vld [vmem:[%s5346_s13 + $0x168] sm:$0xff]  ;;  %v2903_v6 = vld [vmem:[%s5346_s13 + $0x190] sm:$0xff]  ;;  %v2853_v15 = vld [vmem:[%s5346_s13] sm:$0xff] }
 0x377   : > { %2963 = vmatpush.msra.mxu3 %v2898_v26  ;;  %v2886_v12 = vld [vmem:[%s5346_s13 + $0x108] sm:$0xff]  ;;  %2994 = vmatpush.msrb.mxu0 %v2903_v6  ;;  %v2869_v18 = vld [vmem:[%s5346_s13 + $0x80] sm:$0xff]  ;;  %v2591_v26 = vperm.slane %v5113_v33, 3 }
 0x378   : > { %v2572_v22 = vpop.f32.mrf.mxu0  ;;  %v2605_v10 = vpack.c.bf16 %v2597_v20, %v2597_v20  ;;  %v2607_v17 = vpack.c.bf16 %v2604_v21, %v2604_v21  ;;  %v2902_v13 = vld [vmem:[%s5346_s13 + $0x188] sm:$0xff]  ;;  %v2885_v20 = vld [vmem:[%s5346_s13 + $0x100] sm:$0xff] }
 0x379   : > { %v2573_v23 = vadd.f32 %v2572_v22, %v2559_v61  ;;  %2964 = vmatpush.msra.mxu3 %v2897_v28  ;;  %v2872_v61 = vld [vmem:[%s5346_s13 + $0x98] sm:$0xff]  ;;  %v2901_v21 = vld [vmem:[%s5346_s13 + $0x180] sm:$0xff]  ;;  %2995 = vmatpush.msrb.mxu0 %v2902_v13 }
 0x37a   : > { %2808 = vmatmul.bf16.vlgmr.msrb.gmra.mxu2 %v2605_v10  ;;  %2834 = vmatmul.bf16.vlgmr.msra.gmra.mxu0 %v2607_v17  ;;  %v2589_v17 = vperm.slane %v5113_v33, 2 }
 0x37b   : > { %v5123_v24 = vadd.f32 %v2585_v7, %v2573_v23  ;;  %v2587_v44 = vpop.f32.mrf.mxu1  ;;  %2965 = vmatpush.msra.mxu3 %v2896_v19  ;;  %2953 = vmatpush.msra.mxu2 %v2872_v61  ;;  %v2854_v7 = vld [vmem:[%s5346_s13 + $0x8] sm:$0xff] }
 0x37c   : > { %2935 = vmatpush.msra.mxu1 %v2854_v7  ;;  %2996 = vmatpush.msrb.mxu0 %v2901_v21 }
 0x37d   : > { %2966 = vmatpush.msra.mxu3 %v2895_v41  ;;  %2954 = vmatpush.msra.mxu2 %v2871_v4  ;;  %v2590_v36 = vmul.f32 %v2589_v17, %v5123_v24 }
 0x37e   : > { %2936 = vmatpush.msra.mxu1 %v2853_v15 }
 0x37f   : > { %2967 = vmatpush.msra.mxu3 %v2894_v45  ;;  %2955 = vmatpush.msra.mxu2 %v2870_v11  ;;  %v2592_v29 = vadd.f32 %v2591_v26, %v2590_v36 }
 0x380   : > { %v2574_v25 = vpop.f32.mrf.mxu0 }
 0x381   : > { %2968 = vmatpush.msra.mxu3 %v2893_v32  ;;  %2956 = vmatpush.msra.mxu2 %v2869_v18  ;;  %v2839_v25 = vperm.slane %v5113_v33, 4  ;;  %v4219_v33 = vld [vmem:[%s5347_s14] ss:$0 sm:$0xff] }
 0x383   : > { %2969 = vmatpush.msra.mxu3 %v2892_v48 }
 0x385   : > { %2970 = vmatpush.msra.mxu3 %v2891_v52 }
 0x387   : > { %2971 = vmatpush.msra.mxu3 %v2890_v55 }
 0x389   : > { %2972 = vmatpush.msra.mxu3 %v2889_v58 }
 0x38b   : > { %2973 = vmatpush.msra.mxu3 %v2888_v63 }
 0x38d   : > { %2974 = vmatpush.msra.mxu3 %v2887_v5 }
 0x38f   : > { %2975 = vmatpush.msra.mxu3 %v2886_v12 }
 0x391   : > { %2976 = vmatpush.msra.mxu3 %v2885_v20 }
 0x3f7   : > { %v2835_v22 = vpop.f32.mrf.mxu0 }
 0x3f8   : > { %v2822_v10 = vpop.f32.mrf.mxu3 }
 0x3fd   : > { %v2809_v23 = vpop.f32.mrf.mxu2 }
 0x3fe   : > { %v2823_v44 = vadd.f32 %v2822_v10, %v2809_v23 }
 0x3ff   : > { %v2837_v35 = vpop.f32.mrf.mxu0 }
 0x400   : > { %v2836_v27 = vadd.f32 %v2835_v22, %v2823_v44  ;;  %v2824_v9 = vpop.f32.mrf.mxu3 }
 0x402   : > { %v2840_v28 = vmul.f32 %v2839_v25, %v2836_v27 }
 0x404   : > { %v2842_v30 = vadd.f32 %v2841_v1, %v2840_v28 }
 0x405   : > { %v2811_v8 = vpop.f32.mrf.mxu2 }
 0x406   : > { %v2843_v19 = vadd.f32 %v2842_v30, %v2592_v29 }
 0x408   : > { %v2844_v37 = vmax.f32 %v2843_v19, 0.0 }
 0x40a   : > { %2845 = vst [vmem:[#allocation4] sm:$0xff] %v2844_v37 }
 0x411   : > { %v2846_v38 = vld [vmem:[#allocation4] ss:$4 sm:$0x3]  ;;  %v2848_v39 = vld [vmem:[#allocation4 + $0x1] ss:$4 sm:$0x3] }
 0x412   : > { %2937 = vmatmul.f32.vlgmr.msra.gmra.mxu1 %v2846_v38  ;;  %2957 = vmatmul.f32.vlgmr.msra.gmra.mxu2 %v2848_v39  ;;  %v2850_v24 = vld [vmem:[#allocation4 + $0x2] ss:$4 sm:$0x3]  ;;  %v2852_v41 = vld [vmem:[#allocation4 + $0x3] ss:$4 sm:$0x3] }
 0x413   : > { %2977 = vmatmul.f32.vlgmr.msra.gmra.mxu3 %v2850_v24  ;;  %2997 = vmatmul.f32.vlgmr.msrb.gmra.mxu0 %v2852_v41 }
 0x48f   : > { %v2938_v40 = vpop.f32.mrf.mxu1 }
 0x490   : > { %v2939_v42 = vadd.f32 %v4219_v33, %v2938_v40  ;;  %v2998_v16 = vpop.f32.mrf.mxu0 }
 0x495   : > { %v2958_v43 = vpop.f32.mrf.mxu2 }
 0x496   : > { %v2959_v45 = vadd.f32 %v2958_v43, %v2939_v42  ;;  %v2978_v46 = vpop.f32.mrf.mxu3 }
 0x498   : > { %v2979_v31 = vadd.f32 %v2978_v46, %v2959_v45 }
 0x49a   : > { %v2999_v32 = vadd.f32 %v2998_v16, %v2979_v31 }
 0x49c   : > { %3001 = vst [vmem:[%s537_s29] sm:$0x3] %v2999_v32 }
 0x49d   : > { %4337 = shalt.err (!%p4334_p8)
}
 0x49e   : > { %4158 = dma.vmem_to_hbm [thread:$0]  (%p4506_p5), %s3016_s24, 32, %s3018_s28, %s3003_s27  }
 0x49f PF: > { %s5373_s16 = sld [smem:[#allocation17_spill]] }
 0x4a0   : > { %s5374_s9 = sld [smem:[#allocation15_spill]] }
 0x4a5   : > { %p4180_p9 = scmp.ge.s32.totalorder %s5373_s16, 2 }
 0x4a6   : > { %s3029_s20 = sand.u32 1, %s5374_s9  }
 0x4a7   : > { %p4171_p10 = pnand %p4180_p9, %p4510_p6  ;;  %s3030_s29 = scalar_lea.sflag [#allocation7], %s3029_s20 }
 0x4a9   : > { %p4172_p11 = pneg %p4171_p10 }
 0x4ab   : > { %4363 = dma.done.wait (%p4172_p11), %s3030_s29, 32  }
 0x4ac   : > { %4365 = vsyncadd (%p4172_p11), %s3030_s29, 4294967264  ;;  %s5376_s21 = sld [smem:[#allocation18_spill]]  ;;  %s5379_s18 = smov %s4372_s19 }
 0x4ad   : > { %s5377_s22 = sld [smem:[#allocation16_spill]] }
 0x4ae   : > { %s5378_s20 = sld [smem:[#allocation19_spill]] }
 0x4b2   : > { %p27_p12 = scmp.ge.s32.totalorder %s5376_s21, 4  }
 0x4b3   : > { %s5380_s19 = smov %s5377_s22 }
 0x4b4   :  { %29 = sbr.rel (!%p27_p12) target bundleno = 8 (0x8), region = 135 }
 0x4b9   :  { %3036 = vsyncpa [#allocation6], 1 }
 0x4ba   :  { %3038 = vsyncpa [#allocation6 + $0x1], 1 }
 0x4bb   :  { %3039 = vsyncpa [#allocation9], 1 }
 0x4bc   :  { %3040 = vsyncpa [#allocation7], 1 }
 0x4bd   :  { %3042 = vsyncpa [#allocation7 + $0x1], 1 }

</bundles_post_ra>
